<compile_context>
chip_gen: v6e
topology: v6e:2x2x1
jax: 0.10.0
libtpu: 0.0.40
codegen_flags: <defaults>
</compile_context>

<pallas_src>
import functools

import jax
import jax.numpy as jnp
from jax.experimental import pallas as pl
from jax.experimental.pallas import tpu as pltpu


def _mutual_attention_kernel(x_ref, y_ref, wq_ref, bq_ref, wk_ref, bk_ref,
                             wv_ref, bv_ref, wo_ref, bo_ref, temp_ref,
                             mask_ref, o_ref, attn_ref, sqq_ref, sqk_ref,
                             *, hw, tile, ragged):
    f32 = jnp.float32
    cdt = x_ref.dtype                     # MXU operand dtype (no f32 upcast)
    phase = pl.program_id(1)
    t = pl.program_id(2)
    n_t = pl.num_programs(2)

    # ---------------- phase 0: accumulate Gram + channel norms ----------------
    @pl.when(phase == 0)
    def _phase0():
        @pl.when(t == 0)
        def _init():
            attn_ref[...] = jnp.zeros_like(attn_ref)
            sqq_ref[...] = jnp.zeros_like(sqq_ref)
            sqk_ref[...] = jnp.zeros_like(sqk_ref)

        # 1x1 convs == channel-mixing matmuls (f32 accumulation on the MXU).
        q = (jnp.dot(wq_ref[...], x_ref[...], preferred_element_type=f32)
             + bq_ref[...].astype(f32))                       # (C, tile)
        k = (jnp.dot(wk_ref[...], y_ref[...], preferred_element_type=f32)
             + bk_ref[...].astype(f32))

        if ragged:  # zero padded spatial columns of the ragged tail tile
            col = t * tile + jax.lax.broadcasted_iota(jnp.int32, (1, tile), 1)
            valid = col < hw
            q = jnp.where(valid, q, 0.0)
            k = jnp.where(valid, k, 0.0)

        # Fused all-heads Gram: G[i, j] += sum_s q[i, s] * k[j, s]
        attn_ref[...] += jax.lax.dot_general(
            q.astype(cdt), k.astype(cdt), (((1,), (1,)), ((), ())),
            preferred_element_type=f32)
        # Squared L2 norms per channel (folded F.normalize).
        sqq_ref[...] += jnp.sum(q * q, axis=-1, keepdims=True)      # (C, 1)
        ones_row = jnp.ones((1, tile), dtype=f32)
        sqk_ref[...] += jax.lax.dot_general(                        # (1, C)
            ones_row, k * k, (((1,), (1,)), ((), ())),
            preferred_element_type=f32)

        # Last spatial tile: build the softmax'ed block-diagonal attention.
        @pl.when(t == n_t - 1)
        def _finalize():
            # 1 / max(||.||_2, 1e-12) == rsqrt(max(||.||_2^2, 1e-24))
            rq = jax.lax.rsqrt(jnp.maximum(sqq_ref[...], 1e-24))    # (C, 1)
            rk = jax.lax.rsqrt(jnp.maximum(sqk_ref[...], 1e-24))    # (1, C)
            logits = attn_ref[...] * (rq * temp_ref[...]) * rk
            logits = logits + mask_ref[...]   # -inf outside each head's block
            m = jnp.max(logits, axis=-1, keepdims=True)
            e = jnp.exp(logits - m)
            attn_ref[...] = e / jnp.sum(e, axis=-1, keepdims=True)

    # --------- phase 1: stream y again, apply Wv / attention / Wo per tile ---------
    @pl.when(phase == 1)
    def _phase1():
        v = (jnp.dot(wv_ref[...], y_ref[...], preferred_element_type=f32)
             + bv_ref[...].astype(f32))                             # (C, tile)
        av = jnp.dot(attn_ref[...].astype(cdt), v.astype(cdt),
                     preferred_element_type=f32)
        out = (jnp.dot(wo_ref[...], av.astype(cdt), preferred_element_type=f32)
               + bo_ref[...].astype(f32))
        o_ref[...] = out.astype(o_ref.dtype)


def _select_tile(c, hw, itemsize, hw_tile):
    """Pick the HW tile so double-buffered blocks + temporaries fit in VMEM."""
    try:
        vmem_cap = int(pltpu.get_tpu_info().vmem_capacity_bytes)
    except Exception:
        vmem_cap = 64 * 1024 * 1024        # conservative fallback (v7x per-core)
    budget = (vmem_cap * 3) // 4           # headroom for compiler scratch

    # x / y / out tiles double-buffered (HBM dtype) + ~4 f32 (C, tile) temporaries
    per_col = c * (3 * 2 * itemsize + 4 * 4)
    # 4 weights + additive mask (double-buffered) + attention scratch + vectors + slack
    fixed = (c * c * (8 * itemsize + 12) + c * (16 * itemsize + 16) + (2 << 20))

    if hw_tile is None:
        max_cols = max(128, (budget - fixed) // per_col)
        tile = hw if hw <= max_cols else min(hw, max(128, (max_cols // 128) * 128))
    else:
        tile = min(int(hw_tile), hw)
    assert tile == hw or tile % 128 == 0, "HW tile must be a multiple of 128"

    n_t = pl.cdiv(hw, tile)
    est = fixed + per_col * tile
    vmem_limit = int(min(vmem_cap - (2 << 20), max(est + (4 << 20), 32 << 20)))
    return tile, n_t, vmem_limit


def mutual_attention(x, y, params, *, num_heads, hw_tile=None):
    """x, y: (B, C, H, W).  params: wq/bq/wk/bk/wv/bv/wo/bo (1x1-conv weights as
    (C, C) matrices / (C,) biases) and 'temperature' of shape (num_heads,) or
    (num_heads, 1, 1)."""
    assert x.shape == y.shape, "feature maps from image and event branch must match"
    b, c, hgt, wid = x.shape
    assert c % num_heads == 0
    head_c = c // num_heads
    hw = hgt * wid

    # (B, C, H*W): the spatial axis is the 128-lane (fast) dimension.
    x2 = x.reshape(b, c, hw)
    y2 = y.reshape(b, c, hw)

    def as_col(v):
        return v.reshape(c, 1)

    # Per-channel temperature (row scale of the fused (C, C) logits).
    temp_c = jnp.repeat(
        params["temperature"].reshape(num_heads).astype(jnp.float32),
        head_c).reshape(c, 1)
    # Additive block-diagonal head mask: 0 inside a head's block, -inf outside,
    # so the fused softmax over all C columns equals the per-head softmax.
    head_id = jnp.arange(c, dtype=jnp.int32) // head_c
    mask_add = jnp.where(head_id[:, None] == head_id[None, :],
                         0.0, -jnp.inf).astype(jnp.float32)

    tile, n_t, vmem_limit = _select_tile(c, hw, jnp.dtype(x.dtype).itemsize, hw_tile)
    ragged = (hw % tile) != 0
    # TODO(synk): ragged HW tails rely on Pallas discarding out-of-bounds writes
    # of the final partial output block (phase-0 reads are masked in-kernel).

    kernel = functools.partial(_mutual_attention_kernel,
                               hw=hw, tile=tile, ragged=ragged)

    # Grid: (batch, phase, hw-tile).  Phase 0 builds the attention matrix,
    # phase 1 applies it.  Grid-invariant weight blocks are fetched once; x is
    # frozen on its last tile during phase 1 so it is not re-read from HBM.
    def x_map(bi, p, t):
        return (bi, 0, jnp.where(p == 0, t, n_t - 1))

    def y_map(bi, p, t):
        return (bi, 0, t)

    def o_map(bi, p, t):
        return (bi, 0, jnp.where(p == 0, 0, t))

    def const_map(bi, p, t):
        return (0, 0)

    out = pl.pallas_call(
        kernel,
        out_shape=jax.ShapeDtypeStruct((b, c, hw), x.dtype),
        grid_spec=pltpu.PrefetchScalarGridSpec(
            num_scalar_prefetch=0,
            grid=(b, 2, n_t),
            in_specs=[
                pl.BlockSpec((None, c, tile), x_map),      # x[b] spatial tile
                pl.BlockSpec((None, c, tile), y_map),      # y[b] spatial tile
                pl.BlockSpec((c, c), const_map),           # Wq
                pl.BlockSpec((c, 1), const_map),           # bq
                pl.BlockSpec((c, c), const_map),           # Wk
                pl.BlockSpec((c, 1), const_map),           # bk
                pl.BlockSpec((c, c), const_map),           # Wv
                pl.BlockSpec((c, 1), const_map),           # bv
                pl.BlockSpec((c, c), const_map),           # Wo
                pl.BlockSpec((c, 1), const_map),           # bo
                pl.BlockSpec((c, 1), const_map),           # per-channel temperature
                pl.BlockSpec((c, c), const_map),           # additive head mask
            ],
            out_specs=pl.BlockSpec((None, c, tile), o_map),
            scratch_shapes=[
                pltpu.VMEM((c, c), jnp.float32),   # Gram accumulator, reused as attn
                pltpu.VMEM((c, 1), jnp.float32),   # sum(q^2) per channel
                pltpu.VMEM((1, c), jnp.float32),   # sum(k^2) per channel
            ],
        ),
        compiler_params=pltpu.CompilerParams(
            dimension_semantics=("parallel", "arbitrary", "arbitrary"),
            vmem_limit_bytes=vmem_limit,
        ),
    )(
        x2, y2,
        params["wq"], as_col(params["bq"]),
        params["wk"], as_col(params["bk"]),
        params["wv"], as_col(params["bv"]),
        params["wo"], as_col(params["bo"]),
        temp_c, mask_add,
    )
    return out.reshape(b, c, hgt, wid)


def _reference(x, y, params, num_heads):
    """Pure-JAX replica of the PyTorch forward (f32, HIGHEST precision)."""
    b, c, hgt, wid = x.shape
    hw = hgt * wid
    hc = c // num_heads
    hp = jax.lax.Precision.HIGHEST
    f32 = jnp.float32

    def conv1x1(inp, w, bias):
        out = jnp.einsum("oc,bcs->bos", w.astype(f32),
                         inp.reshape(b, c, hw).astype(f32), precision=hp)
        return out + bias.astype(f32)[None, :, None]

    q = conv1x1(x, params["wq"], params["bq"]).reshape(b, num_heads, hc, hw)
    k = conv1x1(y, params["wk"], params["bk"]).reshape(b, num_heads, hc, hw)
    v = conv1x1(y, params["wv"], params["bv"]).reshape(b, num_heads, hc, hw)

    qn = q / jnp.maximum(jnp.linalg.norm(q, axis=-1, keepdims=True), 1e-12)
    kn = k / jnp.maximum(jnp.linalg.norm(k, axis=-1, keepdims=True), 1e-12)

    attn = jnp.einsum("bhcs,bhds->bhcd", qn, kn, precision=hp)
    attn = attn * params["temperature"].reshape(num_heads).astype(f32)[None, :, None, None]
    attn = jax.nn.softmax(attn, axis=-1)
    out = jnp.einsum("bhcd,bhds->bhcs", attn, v, precision=hp).reshape(b, c, hw)
    out = (jnp.einsum("oc,bcs->bos", params["wo"].astype(f32), out, precision=hp)
           + params["bo"].astype(f32)[None, :, None])
    return out.reshape(b, c, hgt, wid)


if __name__ == "__main__":
    key = jax.random.PRNGKey(0)
    B, C, H, W = 2, 32, 16, 16
    NUM_HEADS = 4

    ks = jax.random.split(key, 10)
    x = jax.random.normal(ks[0], (B, C, H, W), dtype=jnp.float32)
    y = jax.random.normal(ks[1], (B, C, H, W), dtype=jnp.float32)

    params = {
        "wq": 0.1 * jax.random.normal(ks[2], (C, C), dtype=jnp.float32),
        "bq": 0.1 * jax.random.normal(ks[3], (C,), dtype=jnp.float32),
        "wk": 0.1 * jax.random.normal(ks[4], (C, C), dtype=jnp.float32),
        "bk": 0.1 * jax.random.normal(ks[5], (C,), dtype=jnp.float32),
        "wv": 0.1 * jax.random.normal(ks[6], (C, C), dtype=jnp.float32),
        "bv": 0.1 * jax.random.normal(ks[7], (C,), dtype=jnp.float32),
        "wo": 0.1 * jax.random.normal(ks[8], (C, C), dtype=jnp.float32),
        "bo": 0.1 * jax.random.normal(ks[9], (C,), dtype=jnp.float32),
        # nn.Parameter(torch.ones(num_heads, 1, 1)) in __init__
        "temperature": jnp.ones((NUM_HEADS,), dtype=jnp.float32),
    }

    ref = _reference(x, y, params, NUM_HEADS)

    # 1) Single-tile fused path (whole (C, H*W) slab resident in VMEM).
    out = jax.block_until_ready(mutual_attention(x, y, params, num_heads=NUM_HEADS))
    assert out.shape == x.shape and out.dtype == x.dtype
    err = float(jnp.max(jnp.abs(out - ref)))
    assert jnp.allclose(out, ref, atol=5e-4, rtol=5e-4), f"single-tile mismatch (max abs err {err})"

    # 2) Spatially tiled two-phase path (forced 128-wide HW tiles).
    out_t = jax.block_until_ready(
        mutual_attention(x, y, params, num_heads=NUM_HEADS, hw_tile=128))
    err_t = float(jnp.max(jnp.abs(out_t - ref)))
    assert jnp.allclose(out_t, ref, atol=5e-4, rtol=5e-4), f"tiled mismatch (max abs err {err_t})"

    # 3) bf16 operand path (no f32 upcast of x/y/weights before the MXU).
    to_bf16 = lambda t: t.astype(jnp.bfloat16)
    params_bf16 = {k: (v if k == "temperature" else to_bf16(v)) for k, v in params.items()}
    out_bf = jax.block_until_ready(
        mutual_attention(to_bf16(x), to_bf16(y), params_bf16, num_heads=NUM_HEADS))
    assert out_bf.shape == x.shape and out_bf.dtype == jnp.bfloat16
    err_bf = float(jnp.max(jnp.abs(out_bf.astype(jnp.float32) - ref)))
    assert err_bf < 0.1, f"bf16 path diverged from f32 reference (max abs err {err_bf})"

    print("KERNEL_OK")
</pallas_src>

<mosaic_0001>
module attributes {stable_mosaic.version = 11 : i64} {
  func.func @_mutual_attention_kernel(%arg0: i32, %arg1: i32, %arg2: i32, %arg3: memref<1x32x256xf32, #tpu.memory_space<vmem>>, %arg4: memref<1x32x256xf32, #tpu.memory_space<vmem>>, %arg5: memref<32x32xf32, #tpu.memory_space<vmem>>, %arg6: memref<32x1xf32, #tpu.memory_space<vmem>>, %arg7: memref<32x32xf32, #tpu.memory_space<vmem>>, %arg8: memref<32x1xf32, #tpu.memory_space<vmem>>, %arg9: memref<32x32xf32, #tpu.memory_space<vmem>>, %arg10: memref<32x1xf32, #tpu.memory_space<vmem>>, %arg11: memref<32x32xf32, #tpu.memory_space<vmem>>, %arg12: memref<32x1xf32, #tpu.memory_space<vmem>>, %arg13: memref<32x1xf32, #tpu.memory_space<vmem>>, %arg14: memref<32x32xf32, #tpu.memory_space<vmem>>, %arg15: memref<1x32x256xf32, #tpu.memory_space<vmem>>, %arg16: memref<32x32xf32, #tpu.memory_space<vmem>>, %arg17: memref<32x1xf32, #tpu.memory_space<vmem>>, %arg18: memref<1x32xf32, #tpu.memory_space<vmem>>) attributes {dimension_semantics = [#tpu.dimension_semantics<parallel>, #tpu.dimension_semantics<arbitrary>, #tpu.dimension_semantics<arbitrary>], iteration_bounds = array<i64: 2, 2, 1>, scalar_prefetch = 0 : i64, scratch_operands = 3 : i64, tpu.core_type = #tpu.core_type<tc>, window_params = [{transform_indices = @transform_0, window_bounds = array<i64: 1, 32, 256>}, {transform_indices = @transform_1, window_bounds = array<i64: 1, 32, 256>}, {pipeline_mode = #tpu.pipeline_mode<synchronous>, transform_indices = @transform_2, window_bounds = array<i64: 32, 32>}, {pipeline_mode = #tpu.pipeline_mode<synchronous>, transform_indices = @transform_3, window_bounds = array<i64: 32, 1>}, {pipeline_mode = #tpu.pipeline_mode<synchronous>, transform_indices = @transform_4, window_bounds = array<i64: 32, 32>}, {pipeline_mode = #tpu.pipeline_mode<synchronous>, transform_indices = @transform_5, window_bounds = array<i64: 32, 1>}, {pipeline_mode = #tpu.pipeline_mode<synchronous>, transform_indices = @transform_6, window_bounds = array<i64: 32, 32>}, {pipeline_mode = #tpu.pipeline_mode<synchronous>, transform_indices = @transform_7, window_bounds = array<i64: 32, 1>}, {pipeline_mode = #tpu.pipeline_mode<synchronous>, transform_indices = @transform_8, window_bounds = array<i64: 32, 32>}, {pipeline_mode = #tpu.pipeline_mode<synchronous>, transform_indices = @transform_9, window_bounds = array<i64: 32, 1>}, {pipeline_mode = #tpu.pipeline_mode<synchronous>, transform_indices = @transform_10, window_bounds = array<i64: 32, 1>}, {pipeline_mode = #tpu.pipeline_mode<synchronous>, transform_indices = @transform_11, window_bounds = array<i64: 32, 32>}, {transform_indices = @transform_12, window_bounds = array<i64: 1, 32, 256>}]} {
    %c0_i32 = arith.constant 0 : i32
    %0 = arith.cmpi eq, %arg1, %c0_i32 : i32
    %1 = arith.extui %0 : i1 to i32
    %c0_i32_0 = arith.constant 0 : i32
    %2 = arith.cmpi ne, %1, %c0_i32_0 : i32
    scf.if %2 {
      %c0_i32_2 = arith.constant 0 : i32
      %6 = arith.cmpi eq, %arg2, %c0_i32_2 : i32
      %7 = arith.extui %6 : i1 to i32
      %c0_i32_3 = arith.constant 0 : i32
      %8 = arith.cmpi ne, %7, %c0_i32_3 : i32
      scf.if %8 {
        %cst_36 = arith.constant 0.000000e+00 : f32
        %42 = vector.broadcast %cst_36 : f32 to vector<32x32xf32>
        %c0_37 = arith.constant 0 : index
        %c0_38 = arith.constant 0 : index
        %43 = vector.load %arg16[%c0_37, %c0_38] : memref<32x32xf32, #tpu.memory_space<vmem>>, vector<32x32xf32>
        tpu.vector_store %arg16[%c0_37, %c0_38], %42 {strides = array<i32>} : memref<32x32xf32, #tpu.memory_space<vmem>>, vector<32x32xf32>,
        %cst_39 = arith.constant 0.000000e+00 : f32
        %44 = vector.broadcast %cst_39 : f32 to vector<32x1xf32>
        %c0_40 = arith.constant 0 : index
        %c0_41 = arith.constant 0 : index
        %45 = vector.load %arg17[%c0_40, %c0_41] : memref<32x1xf32, #tpu.memory_space<vmem>>, vector<32x1xf32>
        tpu.vector_store %arg17[%c0_40, %c0_41], %44 {strides = array<i32>} : memref<32x1xf32, #tpu.memory_space<vmem>>, vector<32x1xf32>,
        %cst_42 = arith.constant 0.000000e+00 : f32
        %46 = vector.broadcast %cst_42 : f32 to vector<1x32xf32>
        %c0_43 = arith.constant 0 : index
        %c0_44 = arith.constant 0 : index
        %47 = vector.load %arg18[%c0_43, %c0_44] : memref<1x32xf32, #tpu.memory_space<vmem>>, vector<1x32xf32>
        tpu.vector_store %arg18[%c0_43, %c0_44], %46 {strides = array<i32>} : memref<1x32xf32, #tpu.memory_space<vmem>>, vector<1x32xf32>,
      } else {
      }
      %c0 = arith.constant 0 : index
      %c0_4 = arith.constant 0 : index
      %9 = vector.load %arg5[%c0, %c0_4] : memref<32x32xf32, #tpu.memory_space<vmem>>, vector<32x32xf32>
      %c0_5 = arith.constant 0 : index
      %c0_6 = arith.constant 0 : index
      %c0_7 = arith.constant 0 : index
      %10 = vector.load %arg3[%c0_5, %c0_6, %c0_7] : memref<1x32x256xf32, #tpu.memory_space<vmem>>, vector<1x32x256xf32>
      %11 = vector.shape_cast %10 : vector<1x32x256xf32> to vector<32x256xf32>
      %cst = arith.constant dense<0.000000e+00> : vector<32x256xf32>
      %12 = tpu.matmul %9, %11, %cst {dimension_numbers = #tpu.dot_dimension_numbers<[1], [0], [0], [1], [0, 0, 1, 1], [], []>} : vector<32x32xf32>, vector<32x256xf32>, vector<32x256xf32> -> vector<32x256xf32>
      %c0_8 = arith.constant 0 : index
      %c0_9 = arith.constant 0 : index
      %13 = vector.load %arg6[%c0_8, %c0_9] : memref<32x1xf32, #tpu.memory_space<vmem>>, vector<32x1xf32>
      %14 = vector.broadcast %13 : vector<32x1xf32> to vector<32x256xf32>
      %15 = arith.addf %12, %14 : vector<32x256xf32>
      %c0_10 = arith.constant 0 : index
      %c0_11 = arith.constant 0 : index
      %16 = vector.load %arg7[%c0_10, %c0_11] : memref<32x32xf32, #tpu.memory_space<vmem>>, vector<32x32xf32>
      %c0_12 = arith.constant 0 : index
      %c0_13 = arith.constant 0 : index
      %c0_14 = arith.constant 0 : index
      %17 = vector.load %arg4[%c0_12, %c0_13, %c0_14] : memref<1x32x256xf32, #tpu.memory_space<vmem>>, vector<1x32x256xf32>
      %18 = vector.shape_cast %17 : vector<1x32x256xf32> to vector<32x256xf32>
      %cst_15 = arith.constant dense<0.000000e+00> : vector<32x256xf32>
      %19 = tpu.matmul %16, %18, %cst_15 {dimension_numbers = #tpu.dot_dimension_numbers<[1], [0], [0], [1], [0, 0, 1, 1], [], []>} : vector<32x32xf32>, vector<32x256xf32>, vector<32x256xf32> -> vector<32x256xf32>
      %c0_16 = arith.constant 0 : index
      %c0_17 = arith.constant 0 : index
      %20 = vector.load %arg8[%c0_16, %c0_17] : memref<32x1xf32, #tpu.memory_space<vmem>>, vector<32x1xf32>
      %21 = vector.broadcast %20 : vector<32x1xf32> to vector<32x256xf32>
      %22 = arith.addf %19, %21 : vector<32x256xf32>
      %c0_18 = arith.constant 0 : index
      %c0_19 = arith.constant 0 : index
      %23 = vector.load %arg16[%c0_18, %c0_19] : memref<32x32xf32, #tpu.memory_space<vmem>>, vector<32x32xf32>
      %cst_20 = arith.constant dense<0.000000e+00> : vector<32x32xf32>
      %24 = tpu.matmul %15, %22, %cst_20 {dimension_numbers = #tpu.dot_dimension_numbers<[1], [1], [0], [0], [0, 0, 1, 0], [], []>} : vector<32x256xf32>, vector<32x256xf32>, vector<32x32xf32> -> vector<32x32xf32>
      %25 = arith.addf %23, %24 : vector<32x32xf32>
      %c0_21 = arith.constant 0 : index
      %c0_22 = arith.constant 0 : index
      %26 = vector.load %arg16[%c0_21, %c0_22] : memref<32x32xf32, #tpu.memory_space<vmem>>, vector<32x32xf32>
      tpu.vector_store %arg16[%c0_21, %c0_22], %25 {strides = array<i32>} : memref<32x32xf32, #tpu.memory_space<vmem>>, vector<32x32xf32>,
      %c0_23 = arith.constant 0 : index
      %c0_24 = arith.constant 0 : index
      %27 = vector.load %arg17[%c0_23, %c0_24] : memref<32x1xf32, #tpu.memory_space<vmem>>, vector<32x1xf32>
      %28 = arith.mulf %15, %15 : vector<32x256xf32>
      %cst_25 = arith.constant dense<0.000000e+00> : vector<32xf32>
      %29 = vector.multi_reduction <add>, %28, %cst_25 [1] : vector<32x256xf32> to vector<32xf32>
      %30 = vector.shape_cast %29 : vector<32xf32> to vector<32x1xf32>
      %31 = arith.addf %27, %30 : vector<32x1xf32>
      %c0_26 = arith.constant 0 : index
      %c0_27 = arith.constant 0 : index
      %32 = vector.load %arg17[%c0_26, %c0_27] : memref<32x1xf32, #tpu.memory_space<vmem>>, vector<32x1xf32>
      tpu.vector_store %arg17[%c0_26, %c0_27], %31 {strides = array<i32>} : memref<32x1xf32, #tpu.memory_space<vmem>>, vector<32x1xf32>,
      %cst_28 = arith.constant 1.000000e+00 : f32
      %33 = vector.broadcast %cst_28 : f32 to vector<1x256xf32>
      %c0_29 = arith.constant 0 : index
      %c0_30 = arith.constant 0 : index
      %34 = vector.load %arg18[%c0_29, %c0_30] : memref<1x32xf32, #tpu.memory_space<vmem>>, vector<1x32xf32>
      %35 = arith.mulf %22, %22 : vector<32x256xf32>
      %cst_31 = arith.constant dense<0.000000e+00> : vector<1x32xf32>
      %36 = tpu.matmul %33, %35, %cst_31 {dimension_numbers = #tpu.dot_dimension_numbers<[1], [1], [0], [0], [0, 0, 1, 0], [], []>} : vector<1x256xf32>, vector<32x256xf32>, vector<1x32xf32> -> vector<1x32xf32>
      %37 = arith.addf %34, %36 : vector<1x32xf32>
      %c0_32 = arith.constant 0 : index
      %c0_33 = arith.constant 0 : index
      %38 = vector.load %arg18[%c0_32, %c0_33] : memref<1x32xf32, #tpu.memory_space<vmem>>, vector<1x32xf32>
      tpu.vector_store %arg18[%c0_32, %c0_33], %37 {strides = array<i32>} : memref<1x32xf32, #tpu.memory_space<vmem>>, vector<1x32xf32>,
      %c0_i32_34 = arith.constant 0 : i32
      %39 = arith.cmpi eq, %arg2, %c0_i32_34 : i32
      %40 = arith.extui %39 : i1 to i32
      %c0_i32_35 = arith.constant 0 : i32
      %41 = arith.cmpi ne, %40, %c0_i32_35 : i32
      scf.if %41 {
        %c0_36 = arith.constant 0 : index
        %c0_37 = arith.constant 0 : index
        %42 = vector.load %arg17[%c0_36, %c0_37] : memref<32x1xf32, #tpu.memory_space<vmem>>, vector<32x1xf32>
        %cst_38 = arith.constant 1.000000e-24 : f32
        %43 = vector.broadcast %cst_38 : f32 to vector<32x1xf32>
        %44 = arith.maximumf %42, %43 : vector<32x1xf32>
        %45 = math.rsqrt %44 : vector<32x1xf32>
        %c0_39 = arith.constant 0 : index
        %c0_40 = arith.constant 0 : index
        %46 = vector.load %arg18[%c0_39, %c0_40] : memref<1x32xf32, #tpu.memory_space<vmem>>, vector<1x32xf32>
        %cst_41 = arith.constant 1.000000e-24 : f32
        %47 = vector.broadcast %cst_41 : f32 to vector<1x32xf32>
        %48 = arith.maximumf %46, %47 : vector<1x32xf32>
        %49 = math.rsqrt %48 : vector<1x32xf32>
        %c0_42 = arith.constant 0 : index
        %c0_43 = arith.constant 0 : index
        %50 = vector.load %arg16[%c0_42, %c0_43] : memref<32x32xf32, #tpu.memory_space<vmem>>, vector<32x32xf32>
        %c0_44 = arith.constant 0 : index
        %c0_45 = arith.constant 0 : index
        %51 = vector.load %arg13[%c0_44, %c0_45] : memref<32x1xf32, #tpu.memory_space<vmem>>, vector<32x1xf32>
        %52 = arith.mulf %45, %51 : vector<32x1xf32>
        %53 = vector.broadcast %52 : vector<32x1xf32> to vector<32x32xf32>
        %54 = arith.mulf %50, %53 : vector<32x32xf32>
        %55 = vector.broadcast %49 : vector<1x32xf32> to vector<32x32xf32>
        %56 = arith.mulf %54, %55 : vector<32x32xf32>
        %c0_46 = arith.constant 0 : index
        %c0_47 = arith.constant 0 : index
        %57 = vector.load %arg14[%c0_46, %c0_47] : memref<32x32xf32, #tpu.memory_space<vmem>>, vector<32x32xf32>
        %58 = arith.addf %56, %57 : vector<32x32xf32>
        %cst_48 = arith.constant dense<0xFF800000> : vector<32xf32>
        %59 = vector.multi_reduction <maximumf>, %58, %cst_48 [1] : vector<32x32xf32> to vector<32xf32>
        %60 = vector.shape_cast %59 : vector<32xf32> to vector<32x1xf32>
        %61 = vector.broadcast %60 : vector<32x1xf32> to vector<32x32xf32>
        %62 = arith.subf %58, %61 : vector<32x32xf32>
        %63 = math.exp %62 : vector<32x32xf32>
        %cst_49 = arith.constant dense<0.000000e+00> : vector<32xf32>
        %64 = vector.multi_reduction <add>, %63, %cst_49 [1] : vector<32x32xf32> to vector<32xf32>
        %65 = vector.shape_cast %64 : vector<32xf32> to vector<32x1xf32>
        %66 = vector.broadcast %65 : vector<32x1xf32> to vector<32x32xf32>
        %67 = arith.divf %63, %66 : vector<32x32xf32>
        %c0_50 = arith.constant 0 : index
        %c0_51 = arith.constant 0 : index
        %68 = vector.load %arg16[%c0_50, %c0_51] : memref<32x32xf32, #tpu.memory_space<vmem>>, vector<32x32xf32>
        tpu.vector_store %arg16[%c0_50, %c0_51], %67 {strides = array<i32>} : memref<32x32xf32, #tpu.memory_space<vmem>>, vector<32x32xf32>,
      } else {
      }
    } else {
    }
    %c1_i32 = arith.constant 1 : i32
    %3 = arith.cmpi eq, %arg1, %c1_i32 : i32
    %4 = arith.extui %3 : i1 to i32
    %c0_i32_1 = arith.constant 0 : i32
    %5 = arith.cmpi ne, %4, %c0_i32_1 : i32
    scf.if %5 {
      %c0 = arith.constant 0 : index
      %c0_2 = arith.constant 0 : index
      %6 = vector.load %arg9[%c0, %c0_2] : memref<32x32xf32, #tpu.memory_space<vmem>>, vector<32x32xf32>
      %c0_3 = arith.constant 0 : index
      %c0_4 = arith.constant 0 : index
      %c0_5 = arith.constant 0 : index
      %7 = vector.load %arg4[%c0_3, %c0_4, %c0_5] : memref<1x32x256xf32, #tpu.memory_space<vmem>>, vector<1x32x256xf32>
      %8 = vector.shape_cast %7 : vector<1x32x256xf32> to vector<32x256xf32>
      %cst = arith.constant dense<0.000000e+00> : vector<32x256xf32>
      %9 = tpu.matmul %6, %8, %cst {dimension_numbers = #tpu.dot_dimension_numbers<[1], [0], [0], [1], [0, 0, 1, 1], [], []>} : vector<32x32xf32>, vector<32x256xf32>, vector<32x256xf32> -> vector<32x256xf32>
      %c0_6 = arith.constant 0 : index
      %c0_7 = arith.constant 0 : index
      %10 = vector.load %arg10[%c0_6, %c0_7] : memref<32x1xf32, #tpu.memory_space<vmem>>, vector<32x1xf32>
      %11 = vector.broadcast %10 : vector<32x1xf32> to vector<32x256xf32>
      %12 = arith.addf %9, %11 : vector<32x256xf32>
      %c0_8 = arith.constant 0 : index
      %c0_9 = arith.constant 0 : index
      %13 = vector.load %arg16[%c0_8, %c0_9] : memref<32x32xf32, #tpu.memory_space<vmem>>, vector<32x32xf32>
      %cst_10 = arith.constant dense<0.000000e+00> : vector<32x256xf32>
      %14 = tpu.matmul %13, %12, %cst_10 {dimension_numbers = #tpu.dot_dimension_numbers<[1], [0], [0], [1], [0, 0, 1, 1], [], []>} : vector<32x32xf32>, vector<32x256xf32>, vector<32x256xf32> -> vector<32x256xf32>
      %c0_11 = arith.constant 0 : index
      %c0_12 = arith.constant 0 : index
      %15 = vector.load %arg11[%c0_11, %c0_12] : memref<32x32xf32, #tpu.memory_space<vmem>>, vector<32x32xf32>
      %cst_13 = arith.constant dense<0.000000e+00> : vector<32x256xf32>
      %16 = tpu.matmul %15, %14, %cst_13 {dimension_numbers = #tpu.dot_dimension_numbers<[1], [0], [0], [1], [0, 0, 1, 1], [], []>} : vector<32x32xf32>, vector<32x256xf32>, vector<32x256xf32> -> vector<32x256xf32>
      %c0_14 = arith.constant 0 : index
      %c0_15 = arith.constant 0 : index
      %17 = vector.load %arg12[%c0_14, %c0_15] : memref<32x1xf32, #tpu.memory_space<vmem>>, vector<32x1xf32>
      %18 = vector.broadcast %17 : vector<32x1xf32> to vector<32x256xf32>
      %19 = arith.addf %16, %18 : vector<32x256xf32>
      %c0_16 = arith.constant 0 : index
      %c0_17 = arith.constant 0 : index
      %c0_18 = arith.constant 0 : index
      %20 = vector.load %arg15[%c0_16, %c0_17, %c0_18] : memref<1x32x256xf32, #tpu.memory_space<vmem>>, vector<1x32x256xf32>
      %21 = vector.shape_cast %20 : vector<1x32x256xf32> to vector<32x256xf32>
      %22 = vector.shape_cast %19 : vector<32x256xf32> to vector<1x32x256xf32>
      tpu.vector_store %arg15[%c0_16, %c0_17, %c0_18], %22 {strides = array<i32>} : memref<1x32x256xf32, #tpu.memory_space<vmem>>, vector<1x32x256xf32>,
    } else {
    }
    return
  }
  func.func @transform_0(%arg0: i32, %arg1: i32, %arg2: i32) -> (i32, i32, i32) {
    %c0_i32 = arith.constant 0 : i32
    %0 = arith.cmpi eq, %arg1, %c0_i32 : i32
    %c0_i32_0 = arith.constant 0 : i32
    %1 = arith.select %0, %arg2, %c0_i32_0 : i32
    %c0_i32_1 = arith.constant 0 : i32
    %c0_i32_2 = arith.constant 0 : i32
    return %arg0, %c0_i32_1, %1 : i32, i32, i32
  }
  func.func @transform_1(%arg0: i32, %arg1: i32, %arg2: i32) -> (i32, i32, i32) {
    %c0_i32 = arith.constant 0 : i32
    %c0_i32_0 = arith.constant 0 : i32
    return %arg0, %c0_i32, %arg2 : i32, i32, i32
  }
  func.func @transform_2(%arg0: i32, %arg1: i32, %arg2: i32) -> (i32, i32) {
    %c0_i32 = arith.constant 0 : i32
    %c0_i32_0 = arith.constant 0 : i32
    %c0_i32_1 = arith.constant 0 : i32
    return %c0_i32, %c0_i32_0 : i32, i32
  }
  func.func @transform_3(%arg0: i32, %arg1: i32, %arg2: i32) -> (i32, i32) {
    %c0_i32 = arith.constant 0 : i32
    %c0_i32_0 = arith.constant 0 : i32
    %c0_i32_1 = arith.constant 0 : i32
    return %c0_i32, %c0_i32_0 : i32, i32
  }
  func.func @transform_4(%arg0: i32, %arg1: i32, %arg2: i32) -> (i32, i32) {
    %c0_i32 = arith.constant 0 : i32
    %c0_i32_0 = arith.constant 0 : i32
    %c0_i32_1 = arith.constant 0 : i32
    return %c0_i32, %c0_i32_0 : i32, i32
  }
  func.func @transform_5(%arg0: i32, %arg1: i32, %arg2: i32) -> (i32, i32) {
    %c0_i32 = arith.constant 0 : i32
    %c0_i32_0 = arith.constant 0 : i32
    %c0_i32_1 = arith.constant 0 : i32
    return %c0_i32, %c0_i32_0 : i32, i32
  }
  func.func @transform_6(%arg0: i32, %arg1: i32, %arg2: i32) -> (i32, i32) {
    %c0_i32 = arith.constant 0 : i32
    %c0_i32_0 = arith.constant 0 : i32
    %c0_i32_1 = arith.constant 0 : i32
    return %c0_i32, %c0_i32_0 : i32, i32
  }
  func.func @transform_7(%arg0: i32, %arg1: i32, %arg2: i32) -> (i32, i32) {
    %c0_i32 = arith.constant 0 : i32
    %c0_i32_0 = arith.constant 0 : i32
    %c0_i32_1 = arith.constant 0 : i32
    return %c0_i32, %c0_i32_0 : i32, i32
  }
  func.func @transform_8(%arg0: i32, %arg1: i32, %arg2: i32) -> (i32, i32) {
    %c0_i32 = arith.constant 0 : i32
    %c0_i32_0 = arith.constant 0 : i32
    %c0_i32_1 = arith.constant 0 : i32
    return %c0_i32, %c0_i32_0 : i32, i32
  }
  func.func @transform_9(%arg0: i32, %arg1: i32, %arg2: i32) -> (i32, i32) {
    %c0_i32 = arith.constant 0 : i32
    %c0_i32_0 = arith.constant 0 : i32
    %c0_i32_1 = arith.constant 0 : i32
    return %c0_i32, %c0_i32_0 : i32, i32
  }
  func.func @transform_10(%arg0: i32, %arg1: i32, %arg2: i32) -> (i32, i32) {
    %c0_i32 = arith.constant 0 : i32
    %c0_i32_0 = arith.constant 0 : i32
    %c0_i32_1 = arith.constant 0 : i32
    return %c0_i32, %c0_i32_0 : i32, i32
  }
  func.func @transform_11(%arg0: i32, %arg1: i32, %arg2: i32) -> (i32, i32) {
    %c0_i32 = arith.constant 0 : i32
    %c0_i32_0 = arith.constant 0 : i32
    %c0_i32_1 = arith.constant 0 : i32
    return %c0_i32, %c0_i32_0 : i32, i32
  }
  func.func @transform_12(%arg0: i32, %arg1: i32, %arg2: i32) -> (i32, i32, i32) {
    %c0_i32 = arith.constant 0 : i32
    %0 = arith.cmpi eq, %arg1, %c0_i32 : i32
    %c0_i32_0 = arith.constant 0 : i32
    %1 = arith.select %0, %c0_i32_0, %arg2 : i32
    %c0_i32_1 = arith.constant 0 : i32
    %c0_i32_2 = arith.constant 0 : i32
    return %arg0, %c0_i32_1, %1 : i32, i32, i32
  }
}

</mosaic_0001>

<bundles_post_ra>
// kernel: tpu_custom_call.1
= control target key start
LH: loop header
LB: loop body
LE: loop exit
PB: predicated region body
PF: predicated region fallthrough
CT: control target
= control target key end

     0   :  { %s2747_s0 = inlined_call_operand.vmem [shape: f32[2,32,256], index: 0, kind: input, shape index: {}]   ;;  %s2748_s1 = inlined_call_operand.hbm [shape: f32[2,32,256], index: 1, kind: input, shape index: {}]   ;;  %s2749_s2 = inlined_call_operand.vmem [shape: f32[32,32], index: 2, kind: input, shape index: {}]   ;;  %s2750_s3 = inlined_call_operand.vmem [shape: f32[32,1], index: 3, kind: input, shape index: {}]   ;;  %s2751_s4 = inlined_call_operand.hbm [shape: f32[32,32], index: 4, kind: input, shape index: {}]   ;;  %s2752_s5 = inlined_call_operand.vmem [shape: f32[32,1], index: 5, kind: input, shape index: {}]   ;;  %s2753_s6 = inlined_call_operand.hbm [shape: f32[32,32], index: 6, kind: input, shape index: {}]   ;;  %s2754_s7 = inlined_call_operand.vmem [shape: f32[32,1], index: 7, kind: input, shape index: {}]   ;;  %s2755_s8 = inlined_call_operand.hbm [shape: f32[32,32], index: 8, kind: input, shape index: {}]   ;;  %s2756_s9 = inlined_call_operand.vmem [shape: f32[32,1], index: 9, kind: input, shape index: {}]   ;;  %s2757_s10 = inlined_call_operand.vmem [shape: f32[32,1], index: 10, kind: input, shape index: {}]   ;;  %s2758_s11 = inlined_call_operand.hbm [shape: f32[32,32], index: 11, kind: input, shape index: {}]   ;;  %s2759_s12 = inlined_call_operand.hbm [shape: f32[2,32,256], index: 12, kind: output, shape index: {}]  }
   0x1   :  { %2767 = sst [smem:[#allocation23_spill]] %s2751_s4 }
   0x2   :  { %2768 = sst [smem:[#allocation24_spill]] %s2753_s6 }
   0x3   :  { %2769 = sst [smem:[#allocation25_spill]] %s2754_s7 }
   0x4   :  { %2770 = sst [smem:[#allocation26_spill]] %s2755_s8 }
   0x5   :  { %2771 = sst [smem:[#allocation27_spill]] %s2756_s9 }
   0x6   :  { %2772 = sst [smem:[#allocation28_spill]] %s2757_s10 }
   0x7   :  { %2773 = sst [smem:[#allocation29_spill]] %s2758_s11 }
   0x8   :  { %2774 = sst [smem:[#allocation30_spill]] %s2759_s12 }
   0x9   :  { %17 = vsyncpa [#allocation6], 0 }
   0xa   :  { %19 = vsyncpa [#allocation6 + $0x1], 0 }
   0xb   :  { %20 = vsyncpa [#allocation9], 0 }
   0xc   :  { %21 = vsyncpa [#allocation12], 0 }
   0xd   :  { %22 = vsyncpa [#allocation7], 0 }
   0xe   :  { %24 = vsyncpa [#allocation7 + $0x1], 0  ;;  %s2289_s21 = smov 0   ;;  %s2291_s22 = smov 0  }
   0xf   :  { %s2293_s23 = smov 0   ;;  %s2295_s24 = smov 0  }
  0x10   :  { %s2297_s25 = smov 0   ;;  %s2299_s26 = smov 0  }
  0x11   :  { %s2301_s27 = smov 0   ;;  %s2303_s28 = smov 0  }
  0x12 LB: > { %2775 = sst [smem:[#allocation19_spill]] %s2177_s21  ;;  %s1751_s29 = sadd.s32 4294967295, %s2205_s28   ;;  %s2205_s28 = sphi %s2303_s28, %s30_s28   ;;  %s2201_s27 = sphi %s2301_s27, %s2807_s27   ;;  %s2197_s26 = sphi %s2299_s26, %s2806_s26   ;;  %s2193_s25 = sphi %s2297_s25, %s2805_s25   ;;  %s2189_s24 = sphi %s2295_s24, %s2804_s24   ;;  %s2185_s23 = sphi %s2293_s23, %s2803_s23   ;;  %s2181_s22 = sphi %s2291_s22, %s2802_s22   ;;  %s2177_s21 = sphi %s2289_s21, %s2801_s21  }
  0x13   : > { %s1752_s30 = sadd.s32 4294967294, %s2205_s28   ;;  %p103_p0 = scmp.ne.s32.totalorder %s2181_s22, %s2177_s21 }
  0x14   : > { %p2333_p1 = scmp.eq.s32.totalorder %s1751_s29, 0  ;;  %p2337_p2 = scmp.eq.s32.totalorder %s1751_s29, 3 }
  0x15   : > { %p349_p3 = scmp.eq.s32.totalorder %s1752_s30, 3  ;;  %p1753_p5 = scmp.ge.s32.totalorder %s2205_s28, 1 }
  0x16   : > { %p2343_p4 = por %p2333_p1, %p103_p0  ;;  %p356_p7 = scmp.lt.s32.totalorder %s2205_s28, 5 }
  0x17   : > { %p2348_p6 = por %p349_p3, %p103_p0  ;;  %s2207_s18 = smov [#allocation8]  }
  0x18   : > { %p2353_p8 = pnand %p1753_p5, %p356_p7  ;;  %s374_s19 = sshll.u32 %s2207_s18, 4  ;;  %s375_s19 = int_to_ptr.vmem [resolvable:$true] %s374_s19 }
  0x19   : > { %s2779_s16 = scalar_select %p2348_p6, 1, 0 }
  0x1a   : > { %p1829_p9 = pneg %p2353_p8  ;;  %s2208_s29 = smov [#allocation11]  }
  0x1b   : > { %2780 = sst [smem:[#allocation20_spill]] %s2779_s16  ;;  %s406_s30 = sshll.u32 %s2208_s29, 4  ;;  %s407_s30 = int_to_ptr.vmem [resolvable:$true] %s406_s30 }
  0x1c   : > { %p2361_p10 = pnand %p1829_p9, %p2333_p1  ;;  %s2209_s16 = smov [#allocation10]  }
  0x1d   : > { %s390_s21 = sshll.u32 %s2209_s16, 4  ;;  %s1980_s12 = scalar_lea.vmem %s375_s19, 512  ;;  %s391_s21 = int_to_ptr.vmem [resolvable:$true] %s390_s21 }
  0x1e   : > { %p1971_p11 = pneg %p2361_p10  ;;  %p1981_p12 = scmp.ne.s32.totalorder %s375_s19, %s1980_s12 }
  0x1f   : > { %p1988_p3 = scmp.lt.s32.totalorder %s375_s19, %s375_s19  ;;  %p1989_p5 = scmp.lt.s32.totalorder %s1980_s12, %s1980_s12 }
  0x20   : > { %p1983_p13 = pnand %p1981_p12, %p1971_p11 }
  0x21   : > { %p1990_p7 = por %p1989_p5, %p1988_p3 }
  0x22   : > { %p1984_p0 = pneg %p1983_p13 }
  0x24   : > { %p1991_p9 = pnand %p1990_p7, %p1984_p0 }
  0x26   : > { %1994 = shalt.err (!%p1991_p9)
}
  0x27   : > { %s2210_s18 = smov 128   ;;  %s2211_s29 = smov 8  }
  0x28   : > { %s2783_s4 = sld [smem:[#allocation23_spill]]  ;;  %s2006_s7 = scalar_lea.vmem %s407_s30, 512 }
  0x29   : > { %p2007_p12 = scmp.ne.s32.totalorder %s407_s30, %s2006_s7  ;;  %p2014_p0 = scmp.lt.s32.totalorder %s407_s30, %s407_s30 }
  0x2a   : > { %p2015_p5 = scmp.lt.s32.totalorder %s2006_s7, %s2006_s7 }
  0x2b   : > { %p2009_p13 = pnand %p2007_p12, %p1971_p11 }
  0x2c   : > { %p2016_p7 = por %p2015_p5, %p2014_p0 }
  0x2d   : > { %p2010_p3 = pneg %p2009_p13 }
  0x2e   : > { %1832 = dma.hbm_to_vmem [thread:$0]  (!%p2361_p10), %s2783_s4, 512, %s375_s19, [#allocation9], %s2210_s18, %s2210_s18, %s2211_s29  }
  0x2f   : > { %p2017_p9 = pnand %p2016_p7, %p2010_p3 }
  0x31   : > { %2020 = shalt.err (!%p2017_p9)
}
  0x32   : > { %s2784_s8 = sld [smem:[#allocation26_spill]]  ;;  %s2032_s9 = scalar_lea.vmem %s391_s21, 512 }
  0x33   : > { %p2033_p6 = scmp.ne.s32.totalorder %s391_s21, %s2032_s9  ;;  %p2040_p0 = scmp.lt.s32.totalorder %s391_s21, %s391_s21 }
  0x34   : > { %p2041_p3 = scmp.lt.s32.totalorder %s2032_s9, %s2032_s9 }
  0x35   : > { %p2035_p12 = pnand %p2033_p6, %p1971_p11 }
  0x36   : > { %p2042_p5 = por %p2041_p3, %p2040_p0 }
  0x37   : > { %p2036_p13 = pneg %p2035_p12 }
  0x38   : > { %1838 = dma.hbm_to_vmem [thread:$0]  (!%p2361_p10), %s2784_s8, 512, %s407_s30, [#allocation12], %s2210_s18, %s2210_s18, %s2211_s29  }
  0x39   : > { %p2043_p7 = pnand %p2042_p5, %p2036_p13 }
  0x3b   : > { %2046 = shalt.err (!%p2043_p7)
}
  0x3c   : > { %s2785_s6 = sld [smem:[#allocation24_spill]]  ;;  %s2212_s19 = smov [#allocation13]  }
  0x3d   : > { %s425_s30 = sshll.u32 %s2212_s19, 4  ;;  %s426_s30 = int_to_ptr.vmem [resolvable:$true] %s425_s30 }
  0x3e   : > { %s2058_s16 = scalar_lea.vmem %s426_s30, 512  ;;  %p2066_p13 = scmp.lt.s32.totalorder %s426_s30, %s426_s30 }
  0x3f   : > { %p2059_p6 = scmp.ne.s32.totalorder %s426_s30, %s2058_s16  ;;  %p2067_p0 = scmp.lt.s32.totalorder %s2058_s16, %s2058_s16 }
  0x41   : > { %p2061_p9 = pnand %p2059_p6, %p1971_p11  ;;  %p2068_p3 = por %p2067_p0, %p2066_p13 }
  0x42   : > { %1835 = dma.hbm_to_vmem [thread:$0]  (!%p2361_p10), %s2785_s6, 512, %s391_s21, [#allocation9], %s2210_s18, %s2210_s18, %s2211_s29  }
  0x43   : > { %p2062_p12 = pneg %p2061_p9 }
  0x45   : > { %p2069_p5 = pnand %p2068_p3, %p2062_p12 }
  0x47   : > { %2072 = shalt.err (!%p2069_p5)
}
  0x48   : > { %s2786_s11 = sld [smem:[#allocation29_spill]]  ;;  %s45_s9 = sadd.s32 1, %s2197_s26 }
  0x49   : > { %s49_s20 = sadd.s32 1, %s2201_s27  ;;  %p47_p11 = scmp.ge.s32.totalorder %s45_s9, 2 }
  0x4a   : > { %s90_s7 = sadd.s32 1, %s2185_s23  ;;  %p97_p7 = scmp.ne.s32.totalorder %s2185_s23, %s2181_s22 }
  0x4b   : > { %p98_p6 = scmp.eq.s32.totalorder %s2205_s28, 0  ;;  %s2809_s9 = smov (%p47_p11, %s45_s9), 0 }
  0x4c   : > { %2787 = sst [smem:[#allocation21_spill]] %s2809_s9  ;;  %s2811_s20 = smov (!%p47_p11, %s49_s20), %s2201_s27 }
  0x4d   : > { %p2420_p9 = por %p98_p6, %p97_p7  ;;  %p2426_p12 = por %p2337_p2, %p97_p7 }
  0x4e   : > { %1841 = dma.hbm_to_vmem [thread:$0]  (!%p2361_p10), %s2786_s11, 512, %s426_s30, [#allocation12], %s2210_s18, %s2210_s18, %s2211_s29  }
  0x4f   : > { %p51_p10 = scmp.ge.s32.totalorder %s2811_s20, 2  ;;  %p1854_p13 = scmp.lt.s32.totalorder %s2205_s28, 4 }
  0x50   : > { %s456_s18 = sand.u32 1, %s2185_s23   ;;  %s1798_s29 = sshll.u32 %s2201_s27, 10 }
  0x51   : > { %s2813_s20 = smov (%p51_p10, %s2811_s20), 0  ;;  %s1759_s30 = sshll.u32 %s456_s18, 6 }
  0x52   : > { %2790 = sst [smem:[#allocation22_spill]] %s2813_s20  ;;  %s85_s16 = ssub.s32 %s2201_s27, %s2813_s20 }
  0x53   : > { %p88_p0 = scmp.eq.s32.totalorder %s85_s16, 0  ;;  %s468_s4 = scalar_lea.hbm %s2748_s1, %s1798_s29 }
  0x54   : > { %s460_s14 = scalar_lea.vmem [#allocation5], %s1759_s30  ;;  %p2442_p2 = pnand %p1854_p13, %p2420_p9 }
  0x55   : > { %s469_s6 = sshll.u32 %s460_s14, 4  ;;  %s457_s9 = scalar_lea.sflag [#allocation6], %s456_s18  ;;  %s470_s6 = int_to_ptr.vmem [resolvable:$true] %s469_s6 }
  0x56   : > { %s2447_s11 = scalar_select %p88_p0, %s2185_s23, %s90_s7  }
  0x57   : > { %p2075_p3 = pneg %p2442_p2  ;;  %s2086_s20 = scalar_lea.vmem %s470_s6, 1024 }
  0x58   : > { %p2087_p5 = scmp.ne.s32.totalorder %s470_s6, %s2086_s20  ;;  %s2213_s16 = smov [#allocation5]  }
  0x59   : > { %s2091_s29 = sshll.u32 %s2213_s16, 4  ;;  %s2092_s29 = int_to_ptr.vmem [resolvable:$false] %s2091_s29 }
  0x5a   : > { %p2089_p11 = pnand %p2087_p5, %p2075_p3  ;;  %s2093_s30 = scalar_lea.vmem %s2092_s29, 2048 }
  0x5b   : > { %p2094_p6 = scmp.lt.s32.totalorder %s470_s6, %s2092_s29  ;;  %p2095_p9 = scmp.lt.s32.totalorder %s2093_s30, %s2086_s20 }
  0x5c   : > { %p2090_p7 = pneg %p2089_p11 }
  0x5d   : > { %p2096_p10 = por %p2095_p9, %p2094_p6 }
  0x5f   : > { %p2097_p13 = pnand %p2096_p10, %p2090_p7 }
  0x61   : > { %2100 = shalt.err (!%p2097_p13)
}
  0x62   : > { %s2214_s10 = smov 256   ;;  %s2215_s7 = smov 16  }
  0x63   : > { %1845 = dma.hbm_to_vmem [thread:$0]  (!%p2442_p2), %s468_s4, 1024, %s470_s6, %s457_s9, %s2214_s10, %s2214_s10, %s2215_s7  }
  0x64   : > { %481 = sbr.rel (%p2353_p8) target bundleno = 1624 (0x658), region = 68  ;;  %s2456_s18 = sand.u32 (!%p2353_p8), 1, %s2181_s22  }
  0x65   : > { %s1763_s21 = sshll.u32 (!%p2353_p8), %s2456_s18, 6  ;;  %s484_s12 = scalar_lea.sflag (!%p2353_p8), [#allocation6], %s2456_s18 }
  0x66   : > { %s2460_s20 = scalar_lea.vmem (!%p2353_p8), [#allocation5], %s1763_s21 }
  0x69   : > { %2160 = dma.done.wait (%p2343_p4), %s484_s12, 1024  }
  0x6a   : > { %2162 = vsyncadd (%p2343_p4), %s484_s12, 4294966272 }
  0x6b   : > { %2164 = dma.done.wait (%p2333_p1), [#allocation9], 1024  }
  0x6c   : > { %2166 = vsyncadd (%p2333_p1), [#allocation9], 4294966272 }
  0x6d   : > { %2168 = dma.done.wait (%p2333_p1), [#allocation12], 1024  }
  0x6e   : > { %2170 = vsyncadd (%p2333_p1), [#allocation12], 4294966272  ;;  %p558_p8 = scmp.lt.s32.totalorder %s2193_s25, 1  ;;  %s2481_s9 = scalar_lea.vmem [#allocation14], %s1763_s21 }
  0x6f   : > { %p1771_p4 = scmp.ne.s32.totalorder %s2189_s24, 0 }
  0x70   : > { %s559_s4 = scalar_select %p558_p8, %s2193_s25, 1 }
  0x71   : > { %576 = sbr.rel (%p1771_p4) target bundleno = 950 (0x3b6), region = 92  ;;  %s2792_s15 = sld [smem:[#allocation28_spill]] (!%p1771_p4) }
  0x72   : > { %s1799_s6 = sshll.u32 %s559_s4, 6 }
  0x73   : > { %s2479_s17 = scalar_lea.vmem %s2747_s0, %s1799_s6 }
  0x76   : > { %v604_v0 = vld [vmem:[%s2479_s17 + $0x38] sm:$0xff]  ;;  %v603_v2 = vld [vmem:[%s2479_s17 + $0x30] sm:$0xff]  ;;  %vm581_vm0 = vcmask 261120   ;;  %v602_v4 = vld [vmem:[%s2479_s17 + $0x28] sm:$0xff]  ;;  %v2216_v6 = vmov 0.0   ;;  %v2217_v23 = vmov 0  }
  0x77   : > { %v742_v1 = vld [vmem:[%s2460_s20 + $0x38] sm:$0xff]  ;;  %666 = vmatprep.subr.mxu0 %v604_v0  ;;  %v741_v3 = vld [vmem:[%s2460_s20 + $0x30] sm:$0xff]  ;;  %v740_v5 = vld [vmem:[%s2460_s20 + $0x28] sm:$0xff]  ;;  %582 = vst.msk [vmem:[#allocation2] sm:$0xff] %vm581_vm0, %v2216_v6  ;;  %706 = vmatprep.mubr.f32.mxu0 %v2216_v6  ;;  %vm586_vm1 = vcmask 7168   ;;  %v2218_v34 = vmov 1.0  }
  0x78   : > { %803 = vmatprep.subr.mxu1 %v742_v1  ;;  %583 = vst.msk [vmem:[#allocation2 + $0x8] sm:$0xff] %vm581_vm0, %v2216_v6  ;;  %584 = vst.msk [vmem:[#allocation2 + $0x10] sm:$0xff] %vm581_vm0, %v2216_v6  ;;  %667 = vmatpush1.msra.mxu0 %v603_v2  ;;  %v601_v7 = vld [vmem:[%s2479_s17 + $0x20] sm:$0xff]  ;;  %v600_v9 = vld [vmem:[%s2479_s17 + $0x18] sm:$0xff]  ;;  %vm591_vm2 = vcmask 253952  }
  0x79   : > { %585 = vst.msk [vmem:[#allocation2 + $0x18] sm:$0xff] %vm581_vm0, %v2216_v6  ;;  %804 = vmatpush1.msra.mxu1 %v741_v3  ;;  %v739_v8 = vld [vmem:[%s2460_s20 + $0x20] sm:$0xff]  ;;  %668 = vmatprep.subr.mxu0 %v602_v4  ;;  %v738_v10 = vld [vmem:[%s2460_s20 + $0x18] sm:$0xff]  ;;  %v599_v11 = vld [vmem:[%s2479_s17 + $0x10] sm:$0xff] }
  0x7a   : > { %805 = vmatprep.subr.mxu1 %v740_v5  ;;  %v737_v12 = vld [vmem:[%s2460_s20 + $0x10] sm:$0xff]  ;;  %669 = vmatpush1.msra.mxu0 %v601_v7  ;;  %v598_v13 = vld [vmem:[%s2479_s17 + $0x8] sm:$0xff]  ;;  %v597_v15 = vld [vmem:[%s2479_s17] sm:$0xff]  ;;  %587 = vst.msk [vmem:[#allocation3] sm:$0xff] %vm586_vm1, %v2216_v6 }
  0x7b   : > { %806 = vmatpush1.msra.mxu1 %v739_v8  ;;  %v736_v14 = vld [vmem:[%s2460_s20 + $0x8] sm:$0xff]  ;;  %670 = vmatprep.subr.mxu0 %v600_v9  ;;  %v735_v16 = vld [vmem:[%s2460_s20] sm:$0xff]  ;;  %v746_v19 = vld [vmem:[%s2752_s5 + $0x18] sm:$0xff]  ;;  %588 = vst.msk [vmem:[#allocation3 + $0x8] sm:$0xff] %vm586_vm1, %v2216_v6 }
  0x7c   : > { %807 = vmatprep.subr.mxu1 %v738_v10  ;;  %671 = vmatpush1.msra.mxu0 %v599_v11  ;;  %v593_v17 = vld [vmem:[%s2749_s2] sm:$0xff]  ;;  %v744_v20 = vld [vmem:[%s2752_s5 + $0x8] sm:$0xff]  ;;  %v745_v24 = vld [vmem:[%s2752_s5 + $0x10] sm:$0xff]  ;;  %589 = vst.msk [vmem:[#allocation3 + $0x10] sm:$0xff] %vm586_vm1, %v2216_v6 }
  0x7d   : > { %808 = vmatpush1.msra.mxu1 %v737_v12  ;;  %672 = vmatprep.subr.mxu0 %v598_v13  ;;  %v731_v18 = vld [vmem:[#allocation8] sm:$0xff]  ;;  %v732_v22 = vld [vmem:[#allocation8 + $0x8] sm:$0xff]  ;;  %v733_v27 = vld [vmem:[#allocation8 + $0x10] sm:$0xff]  ;;  %590 = vst.msk [vmem:[#allocation3 + $0x18] sm:$0xff] %vm586_vm1, %v2216_v6 }
  0x7e   : > { %809 = vmatprep.subr.mxu1 %v736_v14  ;;  %673 = vmatpush1.msra.mxu0 %v597_v15  ;;  %v594_v21 = vld [vmem:[%s2749_s2 + $0x8] sm:$0xff]  ;;  %v743_v25 = vld [vmem:[%s2752_s5] sm:$0xff]  ;;  %v595_v26 = vld [vmem:[%s2749_s2 + $0x10] sm:$0xff]  ;;  %592 = vst.msk [vmem:[#allocation4] sm:$0x1] %vm591_vm2, %v2216_v6 }
  0x7f   : > { %810 = vmatpush1.msra.mxu1 %v735_v16  ;;  %843 = vmatprep.mubr.f32.mxu1 %v2216_v6  ;;  %v605_v28 = vld [vmem:[%s2750_s3] sm:$0xff]  ;;  %v606_v29 = vld [vmem:[%s2750_s3 + $0x8] sm:$0xff]  ;;  %v596_v30 = vld [vmem:[%s2749_s2 + $0x18] sm:$0xff] }
  0x80   : > { %1772 = vmatmul.mubr.msk.f32.vlgmr.msra.gmra.mxu0 %vm581_vm0, %v593_v17  ;;  %1776 = vmatmul.mubr.msk.f32.vlgmr.msra.gmra.mxu1 %vm581_vm0, %v731_v18  ;;  %v734_v31 = vld [vmem:[#allocation8 + $0x18] sm:$0xff]  ;;  %v607_v32 = vld [vmem:[%s2750_s3 + $0x10] sm:$0xff] }
  0x81   : > { %712 = vmatprep.mubr.f32.mxu0 %v2216_v6  ;;  %849 = vmatprep.mubr.f32.mxu1 %v2216_v6  ;;  %v608_v33 = vld [vmem:[%s2750_s3 + $0x18] sm:$0xff] }
  0x82   : > { %1939 = vset.pattern.permute.xlu0 %v2217_v23  ;;  %1940 = vset.pattern.permute.xlu1 %v2217_v23 }
  0x83   : > { %764 = vperm.xlu0 %1939, %v746_v19   ;;  %754 = vperm.xlu1 %1940, %v744_v20  }
  0x84   : > { %1773 = vmatmul.mubr.msk.f32.gmra.mxu0 %vm581_vm0, %v594_v21  ;;  %1777 = vmatmul.mubr.msk.f32.gmra.mxu1 %vm581_vm0, %v732_v22 }
  0x85   : > { %718 = vmatprep.mubr.f32.mxu0 %v2216_v6  ;;  %855 = vmatprep.mubr.f32.mxu1 %v2216_v6 }
  0x87   : > { %759 = vperm.xlu0 %1939, %v745_v24   ;;  %749 = vperm.xlu1 %1940, %v743_v25  }
  0x88   : > { %1774 = vmatmul.mubr.msk.f32.gmra.mxu0 %vm581_vm0, %v595_v26  ;;  %1778 = vmatmul.mubr.msk.f32.gmra.mxu1 %vm581_vm0, %v733_v27 }
  0x89   : > { %724 = vmatprep.mubr.f32.mxu0 %v2216_v6  ;;  %861 = vmatprep.mubr.f32.mxu1 %v2216_v6 }
  0x8b   : > { %611 = vperm.xlu0 %1939, %v605_v28   ;;  %616 = vperm.xlu1 %1940, %v606_v29  }
  0x8c   : > { %1775 = vmatmul.mubr.msk.f32.gmra.mxu0 %vm581_vm0, %v596_v30  ;;  %1779 = vmatmul.mubr.msk.f32.gmra.mxu1 %vm581_vm0, %v734_v31 }
  0x8d   : > { %1071 = vmatprep.mubr.f32.mxu1 %v2218_v34 }
  0x8f   : > { %621 = vperm.xlu0 %1939, %v607_v32   ;;  %626 = vperm.xlu1 %1940, %v608_v33   ;;  %v965_v32 = vld [vmem:[#allocation3] sm:$0xff] }
  0xfe   : > { %v765_v35 = vpop.permute.xlu0 %764  ;;  %v755_v36 = vpop.permute.xlu1 %754 }
 0x102   : > { %v760_v37 = vpop.permute.xlu0 %759  ;;  %v2569_v38 = vpop.permute.xlu1 %749 }
 0x106   : > { %v612_v41 = vpop.permute.xlu0 %611  ;;  %v617_v48 = vpop.permute.xlu1 %616 }
 0x10a   : > { %v622_v58 = vpop.permute.xlu0 %621  ;;  %v627_v0 = vpop.permute.xlu1 %626 }
 0x140   : > { %v708_v39 = vpop.f32.mrf.mxu0  ;;  %v2571_v40 = vpop.f32.mrf.mxu1 }
 0x141   : > { %v2573_v42 = vadd.f32 %v708_v39, %v612_v41  ;;  %v846_v28 = vadd.f32 %v2571_v40, %v2569_v38  ;;  %v967_v39 = vld [vmem:[#allocation3 + $0x10] sm:$0xff] }
 0x142   : > { %v710_v43 = vpop.f32.mrf.mxu0  ;;  %v847_v44 = vpop.f32.mrf.mxu1 }
 0x143   : > { %v711_v45 = vadd.f32 %v710_v43, %v612_v41  ;;  %v969_v50 = vmul.f32 %v2573_v42, %v2573_v42  ;;  %v848_v26 = vadd.f32 %v847_v44, %v2569_v38  ;;  %v999_v31 = vmul.f32 %v846_v28, %v846_v28  ;;  %v968_v41 = vld [vmem:[#allocation3 + $0x18] sm:$0xff] }
 0x144   : > { %v714_v46 = vpop.f32.mrf.mxu0  ;;  %v851_v47 = vpop.f32.mrf.mxu1 }
 0x145   : > { %v970_v49 = vmul.f32 %v711_v45, %v711_v45  ;;  %936 = vmatprep.mubr.f32.mxu0 %v711_v45  ;;  %v2577_v51 = vadd.f32 %v714_v46, %v617_v48  ;;  %v852_v24 = vadd.f32 %v851_v47, %v755_v36  ;;  %v1000_v30 = vmul.f32 %v848_v26, %v848_v26 }
 0x146   : > { %v716_v52 = vpop.f32.mrf.mxu0  ;;  %v853_v53 = vpop.f32.mrf.mxu1 }
 0x147   : > { %v717_v54 = vadd.f32 %v716_v52, %v617_v48  ;;  %v977_v57 = vadd.f32 %v970_v49, %v969_v50  ;;  %v971_v60 = vmul.f32 %v2577_v51, %v2577_v51  ;;  %v854_v21 = vadd.f32 %v853_v53, %v755_v36  ;;  %v966_v36 = vld [vmem:[#allocation3 + $0x8] sm:$0xff] }
 0x148   : > { %v720_v55 = vpop.f32.mrf.mxu0  ;;  %v857_v56 = vpop.f32.mrf.mxu1  ;;  %v1001_v29 = vmul.f32 %v852_v24, %v852_v24 }
 0x149   : > { %v972_v59 = vmul.f32 %v717_v54, %v717_v54  ;;  %v721_v61 = vadd.f32 %v720_v55, %v622_v58  ;;  %978 = vadd.xlane.f32.xlu0 %v977_v57  ;;  %v858_v19 = vadd.f32 %v857_v56, %v760_v37  ;;  %v1002_v27 = vmul.f32 %v854_v21, %v854_v21  ;;  %v1104_v57 = vld [vmem:[%s2792_s15 + $0x10] sm:$0xff] }
 0x14a   : > { %v722_v62 = vpop.f32.mrf.mxu0  ;;  %v859_v63 = vpop.f32.mrf.mxu1 }
 0x14b   : > { %v723_v1 = vadd.f32 %v722_v62, %v622_v58  ;;  %v980_v4 = vadd.f32 %v972_v59, %v971_v60  ;;  %v973_v8 = vmul.f32 %v721_v61, %v721_v61  ;;  %v860_v12 = vadd.f32 %v859_v63, %v760_v37  ;;  %v1105_v60 = vld [vmem:[%s2792_s15 + $0x18] sm:$0xff]  ;;  %v868_v63 = vld [vmem:[#allocation2] sm:$0xff] }
 0x14c   : > { %v726_v2 = vpop.f32.mrf.mxu0  ;;  %v863_v3 = vpop.f32.mrf.mxu1  ;;  %v1003_v25 = vmul.f32 %v858_v19, %v858_v19 }
 0x14d   : > { %v974_v5 = vmul.f32 %v723_v1, %v723_v1  ;;  %v727_v7 = vadd.f32 %v726_v2, %v627_v0  ;;  %v864_v9 = vadd.f32 %v863_v3, %v765_v35  ;;  %981 = vadd.xlane.f32.xlu1 %v980_v4  ;;  %v1004_v22 = vmul.f32 %v860_v12, %v860_v12  ;;  %v869_v4 = vld [vmem:[#allocation2 + $0x8] sm:$0xff] }
 0x14e   : > { %v728_v10 = vpop.f32.mrf.mxu0  ;;  %v865_v11 = vpop.f32.mrf.mxu1 }
 0x14f   : > { %v729_v13 = vadd.f32 %v728_v10, %v627_v0  ;;  %v866_v14 = vadd.f32 %v865_v11, %v765_v35  ;;  %v983_v15 = vadd.f32 %v974_v5, %v973_v8  ;;  %v975_v16 = vmul.f32 %v727_v7, %v727_v7 }
 0x150   : > { %v1005_v20 = vmul.f32 %v864_v9, %v864_v9 }
 0x151   : > { %v976_v17 = vmul.f32 %v729_v13, %v729_v13  ;;  %v1006_v18 = vmul.f32 %v866_v14, %v866_v14  ;;  %896 = vmatprep.subr.mxu0 %v866_v14  ;;  %984 = vadd.xlane.f32.xlu0 %v983_v15 }
 0x152   : > { %897 = vmatpush1.xpose.msra.mxu0 %v864_v9 }
 0x153   : > { %898 = vmatprep.subr.mxu0 %v860_v12  ;;  %1031 = vmatprep.subr.mxu1 %v1006_v18  ;;  %v986_v23 = vadd.f32 %v976_v17, %v975_v16  ;;  %v870_v12 = vld [vmem:[#allocation2 + $0x10] sm:$0xff]  ;;  %v871_v16 = vld [vmem:[#allocation2 + $0x18] sm:$0xff] }
 0x154   : > { %1032 = vmatpush1.xpose.msra.mxu1 %v1005_v20 }
 0x155   : > { %1033 = vmatprep.subr.mxu1 %v1004_v22  ;;  %987 = vadd.xlane.f32.xlu0 %v986_v23  ;;  %v1135_v22 = vlaneseq }
 0x156   : > { %899 = vmatpush1.xpose.msra.mxu0 %v858_v19 }
 0x157   : > { %900 = vmatprep.subr.mxu0 %v854_v21  ;;  %v1136_v23 = vshrl.u32 %v1135_v22, 7 }
 0x158   : > { %1034 = vmatpush1.xpose.msra.mxu1 %v1003_v25 }
 0x159   : > { %1035 = vmatprep.subr.mxu1 %v1002_v27 }
 0x15a   : > { %901 = vmatpush1.xpose.msra.mxu0 %v852_v24  ;;  %v1137_v24 = vsub.s32 0, %v1136_v23 }
 0x15b   : > { %902 = vmatprep.subr.mxu0 %v848_v26 }
 0x15c   : > { %1036 = vmatpush1.xpose.msra.mxu1 %v1001_v29 }
 0x15d   : > { %1037 = vmatprep.subr.mxu1 %v1000_v30  ;;  %v1144_v30 = vld [vmem:[#allocation13] sm:$0xff] }
 0x15e   : > { %903 = vmatpush1.xpose.msra.mxu0 %v846_v28 }
 0x160   : > { %1038 = vmatpush1.xpose.msra.mxu1 %v999_v31 }
 0x161   : > { %937 = vmatmul.mubr.f32.vlgmr.msra.gmra.mxu0 %v2573_v42 }
 0x162   : > { %941 = vmatprep.mubr.f32.mxu0 %v717_v54  ;;  %v1103_v54 = vld [vmem:[%s2792_s15 + $0x8] sm:$0xff] }
 0x163   : > { %1072 = vmatmul.mubr.f32.vlgmr.msra.gmra.mxu1 %v2218_v34 }
 0x165   : > { %942 = vmatmul.mubr.f32.gmra.mxu0 %v2577_v51  ;;  %v1102_v51 = vld [vmem:[%s2792_s15] sm:$0xff] }
 0x166   : > { %946 = vmatprep.mubr.f32.mxu0 %v723_v1  ;;  %v998_v1 = vld [vmem:[#allocation4] sm:$0x1] }
 0x169   : > { %947 = vmatmul.mubr.f32.gmra.mxu0 %v721_v61 }
 0x16a   : > { %951 = vmatprep.mubr.f32.mxu0 %v729_v13 }
 0x16d   : > { %952 = vmatmul.mubr.f32.gmra.mxu0 %v727_v7 }
 0x1d2   : > { %v979_v33 = vpop.xlane.xlu0 %978 }
 0x1d3   : > { %v989_v35 = vadd.f32 %v979_v33, %v965_v32 }
 0x1d5   : > { %994 = vst.msk [vmem:[#allocation3] sm:$0xff] %vm586_vm1, %v989_v35 }
 0x1d6   : > { %v982_v37 = vpop.xlane.xlu1 %981 }
 0x1d7   : > { %v990_v38 = vadd.f32 %v982_v37, %v966_v36  ;;  %v1145_v37 = vld [vmem:[#allocation13 + $0x8] sm:$0xff] }
 0x1d9   : > { %995 = vst.msk [vmem:[#allocation3 + $0x8] sm:$0xff] %vm586_vm1, %v990_v38 }
 0x1da   : > { %v985_v34 = vpop.xlane.xlu0 %984 }
 0x1db   : > { %v991_v40 = vadd.f32 %v985_v34, %v967_v39 }
 0x1dc   : > { %v1083_v42 = vld [vmem:[#allocation3] sm:$0xff] }
 0x1dd   : > { %996 = vst.msk [vmem:[#allocation3 + $0x10] sm:$0xff] %vm586_vm1, %v991_v40  ;;  %v1087_v43 = vmax.f32 %v1083_v42, 1e-24 }
 0x1de   : > { %v988_v44 = vpop.xlane.xlu0 %987 }
 0x1df   : > { %v992_v6 = vadd.f32 %v988_v44, %v968_v41  ;;  %1941 = vrsqrt.f32 %v1087_v43  ;;  %v1146_v43 = vld [vmem:[#allocation13 + $0x10] sm:$0xff] }
 0x1e0   : > { %v1084_v45 = vld [vmem:[#allocation3 + $0x8] sm:$0xff] }
 0x1e1   : > { %997 = vst.msk [vmem:[#allocation3 + $0x18] sm:$0xff] %vm586_vm1, %v992_v6  ;;  %v1088_v46 = vmax.f32 %v1084_v45, 1e-24 }
 0x1e3   : > { %1943 = vrsqrt.f32 %v1088_v46 }
 0x1e4   : > { %v1085_v47 = vld [vmem:[#allocation3 + $0x10] sm:$0xff] }
 0x1e5   : > { %v1089_v48 = vmax.f32 %v1085_v47, 1e-24 }
 0x1e7   : > { %1945 = vrsqrt.f32 %v1089_v48 }
 0x1e8   : > { %v1086_v49 = vld [vmem:[#allocation3 + $0x18] sm:$0xff] }
 0x1e9   : > { %v1090_v50 = vmax.f32 %v1086_v49, 1e-24  ;;  %v1147_v49 = vld [vmem:[#allocation13 + $0x18] sm:$0xff] }
 0x1eb   : > { %1947 = vrsqrt.f32 %v1090_v50 }
 0x1ec   : > { %v1942_v52 = vpop.eup %1941 }
 0x1ed   : > { %v1106_v53 = vmul.f32 %v1942_v52, %v1102_v51 }
 0x1ef   : > { %1112 = vperm.xlu1 %1940, %v1106_v53  }
 0x1f0   : > { %v1944_v55 = vpop.eup %1943 }
 0x1f1   : > { %v1107_v56 = vmul.f32 %v1944_v55, %v1103_v54 }
 0x1f3   : > { %1117 = vperm.xlu0 %1939, %v1107_v56  }
 0x1f4   : > { %v1946_v58 = vpop.eup %1945 }
 0x1f5   : > { %v1108_v59 = vmul.f32 %v1946_v58, %v1104_v57 }
 0x1f7   : > { %1122 = vperm.xlu1 %1940, %v1108_v59  }
 0x1f8   : > { %v1948_v61 = vpop.eup %1947 }
 0x1f9   : > { %v1109_v62 = vmul.f32 %v1948_v61, %v1105_v60 }
 0x1fb   : > { %1127 = vperm.xlu1 %1940, %v1109_v62  }
 0x221   : > { %v938_v0 = vpop.f32.mrf.mxu0 }
 0x222   : > { %v957_v2 = vadd.f32 %v938_v0, %v868_v63 }
 0x223   : > { %v940_v3 = vpop.f32.mrf.mxu0  ;;  %v1073_v5 = vpop.f32.mrf.mxu1 }
 0x224   : > { %961 = vst.msk [vmem:[#allocation2] sm:$0xff] %vm581_vm0, %v957_v2  ;;  %v1077_v7 = vadd.f32 %v1073_v5, %v998_v1 }
 0x225   : > { %v943_v8 = vpop.f32.mrf.mxu0  ;;  %v1075_v9 = vpop.f32.mrf.mxu1 }
 0x226   : > { %v958_v10 = vadd.f32 %v943_v8, %v869_v4  ;;  %1079 = vst.msk [vmem:[#allocation4] sm:$0x1] %vm591_vm2, %v1077_v7 }
 0x227   : > { %v945_v11 = vpop.f32.mrf.mxu0 }
 0x228   : > { %962 = vst.msk [vmem:[#allocation2 + $0x8] sm:$0xff] %vm581_vm0, %v958_v10 }
 0x229   : > { %v948_v13 = vpop.f32.mrf.mxu0 }
 0x22a   : > { %v959_v14 = vadd.f32 %v948_v13, %v870_v12 }
 0x22b   : > { %v950_v15 = vpop.f32.mrf.mxu0  ;;  %v1098_v28 = vld [vmem:[#allocation2] sm:$0xff] }
 0x22c   : > { %963 = vst.msk [vmem:[#allocation2 + $0x10] sm:$0xff] %vm581_vm0, %v959_v14 }
 0x22d   : > { %v953_v17 = vpop.f32.mrf.mxu0  ;;  %v1095_v20 = vld [vmem:[#allocation4] sm:$0x1] }
 0x22e   : > { %v960_v18 = vadd.f32 %v953_v17, %v871_v16  ;;  %v1096_v21 = vmax.f32 %v1095_v20, 1e-24 }
 0x22f   : > { %v955_v19 = vpop.f32.mrf.mxu0  ;;  %v1099_v33 = vld [vmem:[#allocation2 + $0x8] sm:$0xff] }
 0x230   : > { %964 = vst.msk [vmem:[#allocation2 + $0x18] sm:$0xff] %vm581_vm0, %v960_v18  ;;  %1949 = vrsqrt.f32 %v1096_v21 }
 0x233   : > { %v1100_v40 = vld [vmem:[#allocation2 + $0x10] sm:$0xff] }
 0x237   : > { %v1101_v46 = vld [vmem:[#allocation2 + $0x18] sm:$0xff] }
 0x23d   : > { %v1950_v25 = vpop.eup %1949 }
 0x23e   : > { %v1138_v26 = vrot.slane %v1950_v25, %v1137_v24 }
 0x26a   : > { %v1113_v27 = vpop.permute.xlu1 %1112 }
 0x26b   : > { %v1130_v29 = vmul.f32 %v1113_v27, %v1098_v28 }
 0x26d   : > { %v1140_v31 = vmul.f32 %v1138_v26, %v1130_v29 }
 0x26e   : > { %v1118_v32 = vpop.permute.xlu0 %1117 }
 0x26f   : > { %v1131_v35 = vmul.f32 %v1118_v32, %v1099_v33  ;;  %v1148_v36 = vadd.f32 %v1144_v30, %v1140_v31 }
 0x271   : > { %v1141_v38 = vmul.f32 %v1138_v26, %v1131_v35  ;;  %v1152_v39 = vsel %vm581_vm0, %v1148_v36, -inf }
 0x272   : > { %v1123_v34 = vpop.permute.xlu1 %1122  ;;  %1153 = vmax.xlane.f32.xlu0 %v1152_v39 }
 0x273   : > { %v1132_v41 = vmul.f32 %v1123_v34, %v1100_v40  ;;  %v1149_v42 = vadd.f32 %v1145_v37, %v1141_v38 }
 0x275   : > { %v1142_v44 = vmul.f32 %v1138_v26, %v1132_v41  ;;  %v1155_v6 = vsel %vm581_vm0, %v1149_v42, -inf }
 0x276   : > { %v1128_v45 = vpop.permute.xlu1 %1127  ;;  %1156 = vmax.xlane.f32.xlu1 %v1155_v6 }
 0x277   : > { %v1133_v47 = vmul.f32 %v1128_v45, %v1101_v46  ;;  %v1150_v48 = vadd.f32 %v1146_v43, %v1142_v44 }
 0x279   : > { %v1143_v50 = vmul.f32 %v1138_v26, %v1133_v47  ;;  %v1158_v51 = vsel %vm581_vm0, %v1150_v48, -inf }
 0x27a   : > { %1159 = vmax.xlane.f32.xlu0 %v1158_v51 }
 0x27b   : > { %v1151_v52 = vadd.f32 %v1147_v49, %v1143_v50 }
 0x27d   : > { %v1161_v53 = vsel %vm581_vm0, %v1151_v52, -inf }
 0x27e   : > { %1162 = vmax.xlane.f32.xlu0 %v1161_v53 }
 0x2fb   : > { %v1154_v54 = vpop.xlane.xlu0 %1153 }
 0x2fc   : > { %v1164_v55 = vsub.f32 %v1148_v36, %v1154_v54 }
 0x2fe   : > { %v1168_v56 = vmul.f32 1.442695, %v1164_v55 }
 0x2ff   : > { %v1157_v57 = vpop.xlane.xlu1 %1156 }
 0x300   : > { %1951 = vpow2.f32 %v1168_v56  ;;  %v1165_v58 = vsub.f32 %v1149_v42, %v1157_v57 }
 0x302   : > { %v1170_v59 = vmul.f32 1.442695, %v1165_v58 }
 0x303   : > { %v1160_v60 = vpop.xlane.xlu0 %1159 }
 0x304   : > { %1953 = vpow2.f32 %v1170_v59  ;;  %v1166_v61 = vsub.f32 %v1150_v48, %v1160_v60 }
 0x306   : > { %v1172_v62 = vmul.f32 1.442695, %v1166_v61 }
 0x307   : > { %v1163_v63 = vpop.xlane.xlu0 %1162 }
 0x308   : > { %1955 = vpow2.f32 %v1172_v62  ;;  %v1167_v0 = vsub.f32 %v1151_v52, %v1163_v63 }
 0x30a   : > { %v1174_v1 = vmul.f32 1.442695, %v1167_v0 }
 0x30c   : > { %1957 = vpow2.f32 %v1174_v1 }
 0x30d   : > { %v1952_v2 = vpop.eup %1951 }
 0x30e   : > { %v1176_v3 = vsel %vm581_vm0, %v1952_v2, 0.0 }
 0x30f   : > { %1177 = vadd.xlane.f32.xlu1 %v1176_v3 }
 0x311   : > { %v1954_v4 = vpop.eup %1953 }
 0x312   : > { %v1179_v5 = vsel %vm581_vm0, %v1954_v4, 0.0 }
 0x313   : > { %1180 = vadd.xlane.f32.xlu0 %v1179_v5 }
 0x315   : > { %v1956_v7 = vpop.eup %1955 }
 0x316   : > { %v1182_v8 = vsel %vm581_vm0, %v1956_v7, 0.0 }
 0x317   : > { %1183 = vadd.xlane.f32.xlu1 %v1182_v8 }
 0x319   : > { %v1958_v9 = vpop.eup %1957 }
 0x31a   : > { %v1185_v10 = vsel %vm581_vm0, %v1958_v9, 0.0 }
 0x31b   : > { %1186 = vadd.xlane.f32.xlu0 %v1185_v10 }
 0x398   : > { %v1178_v11 = vpop.xlane.xlu1 %1177 }
 0x399   : > { %1959 = vrcp.f32 %v1178_v11 }
 0x39c   : > { %v1181_v12 = vpop.xlane.xlu0 %1180 }
 0x39d   : > { %1961 = vrcp.f32 %v1181_v12 }
 0x3a0   : > { %v1184_v13 = vpop.xlane.xlu1 %1183 }
 0x3a1   : > { %1963 = vrcp.f32 %v1184_v13 }
 0x3a4   : > { %v1187_v14 = vpop.xlane.xlu0 %1186 }
 0x3a5   : > { %1965 = vrcp.f32 %v1187_v14 }
 0x3a6   : > { %v1960_v15 = vpop.eup %1959 }
 0x3a7   : > { %v1189_v16 = vmul.f32 %v1960_v15, %v1952_v2 }
 0x3a9   : > { %1196 = vst.msk [vmem:[#allocation2] sm:$0xff] %vm581_vm0, %v1189_v16 }
 0x3aa   : > { %v1962_v17 = vpop.eup %1961 }
 0x3ab   : > { %v1191_v18 = vmul.f32 %v1962_v17, %v1954_v4 }
 0x3ad   : > { %1197 = vst.msk [vmem:[#allocation2 + $0x8] sm:$0xff] %vm581_vm0, %v1191_v18 }
 0x3ae   : > { %v1964_v19 = vpop.eup %1963 }
 0x3af   : > { %v1193_v20 = vmul.f32 %v1964_v19, %v1956_v7 }
 0x3b1   : > { %1198 = vst.msk [vmem:[#allocation2 + $0x10] sm:$0xff] %vm581_vm0, %v1193_v20 }
 0x3b2   : > { %v1966_v21 = vpop.eup %1965 }
 0x3b3   : > { %v1195_v22 = vmul.f32 %v1966_v21, %v1958_v9 }
 0x3b5   : > { %1199 = vst.msk [vmem:[#allocation2 + $0x18] sm:$0xff] %vm581_vm0, %v1195_v22 }
 0x3b6 PF: > { %p1780_p1 = scmp.ne.s32.totalorder %s2189_s24, 1 }
 0x3b7   : > { %s2793_s7 = sld [smem:[#allocation25_spill]] (!%p1780_p1) }
 0x3b8   : > { %1203 = sbr.rel (%p1780_p1) target bundleno = 1600 (0x640), region = 104  ;;  %s2794_s14 = sld [smem:[#allocation27_spill]] (!%p1780_p1) }
 0x3bd   : > { %v1215_v23 = vld [vmem:[%s2460_s20 + $0x38] sm:$0xff]  ;;  %v1214_v24 = vld [vmem:[%s2460_s20 + $0x30] sm:$0xff]  ;;  %v1213_v25 = vld [vmem:[%s2460_s20 + $0x28] sm:$0xff]  ;;  %vm1240_vm3 = vcmask 261120   ;;  %v2219_v32 = vmov 0.0   ;;  %v2220_v37 = vmov 0  }
 0x3be   : > { %1801 = vmatprep.subr.mxu1 %v1215_v23  ;;  %1277 = vmatprep.subr.mxu0 %v1215_v23  ;;  %v1212_v26 = vld [vmem:[%s2460_s20 + $0x20] sm:$0xff]  ;;  %v1211_v27 = vld [vmem:[%s2460_s20 + $0x18] sm:$0xff]  ;;  %v1210_v28 = vld [vmem:[%s2460_s20 + $0x10] sm:$0xff] }
 0x3bf   : > { %1805 = vmatpush1.msra.mxu1 %v1214_v24  ;;  %1278 = vmatpush1.msra.mxu0 %v1214_v24  ;;  %v1209_v29 = vld [vmem:[%s2460_s20 + $0x8] sm:$0xff]  ;;  %v1208_v30 = vld [vmem:[%s2460_s20] sm:$0xff]  ;;  %v1206_v31 = vld [vmem:[#allocation10 + $0x10] sm:$0xff] }
 0x3c0   : > { %1802 = vmatprep.subr.mxu1 %v1213_v25  ;;  %1279 = vmatprep.subr.mxu0 %v1213_v25  ;;  %v1204_v33 = vld [vmem:[#allocation10] sm:$0xff]  ;;  %v1219_v35 = vld [vmem:[%s2793_s7 + $0x18] sm:$0xff]  ;;  %v1205_v39 = vld [vmem:[#allocation10 + $0x8] sm:$0xff] }
 0x3c1   : > { %1806 = vmatpush1.msra.mxu1 %v1212_v26  ;;  %1280 = vmatpush1.msra.mxu0 %v1212_v26  ;;  %v1207_v36 = vld [vmem:[#allocation10 + $0x18] sm:$0xff]  ;;  %v1217_v38 = vld [vmem:[%s2793_s7 + $0x8] sm:$0xff]  ;;  %v1218_v34 = vld [vmem:[%s2793_s7 + $0x10] sm:$0xff] }
 0x3c2   : > { %1803 = vmatprep.subr.mxu1 %v1211_v27  ;;  %1281 = vmatprep.subr.mxu0 %v1211_v27  ;;  %v1216_v40 = vld [vmem:[%s2793_s7] sm:$0xff]  ;;  %v1452_v42 = vld [vmem:[%s2794_s14 + $0x8] sm:$0xff]  ;;  %v1453_v43 = vld [vmem:[%s2794_s14 + $0x10] sm:$0xff] }
 0x3c3   : > { %1807 = vmatpush1.msra.mxu1 %v1210_v28  ;;  %1282 = vmatpush1.msra.mxu0 %v1210_v28  ;;  %v1451_v41 = vld [vmem:[%s2794_s14] sm:$0xff]  ;;  %v1454_v44 = vld [vmem:[%s2794_s14 + $0x18] sm:$0xff]  ;;  %v1343_v1 = vld [vmem:[#allocation2 + $0x8] sm:$0xff] }
 0x3c4   : > { %1804 = vmatprep.subr.mxu1 %v1209_v29  ;;  %1329 = vmatprep.mubr.f32.mxu1 %v2219_v32  ;;  %v1342_v0 = vld [vmem:[#allocation2] sm:$0xff]  ;;  %v1344_v2 = vld [vmem:[#allocation2 + $0x10] sm:$0xff]  ;;  %v1345_v3 = vld [vmem:[#allocation2 + $0x18] sm:$0xff] }
 0x3c5   : > { %1808 = vmatpush1.msra.mxu1 %v1208_v30  ;;  %1283 = vmatprep.subr.mxu0 %v1209_v29  ;;  %v1447_v13 = vld [vmem:[#allocation11] sm:$0xff]  ;;  %v1448_v14 = vld [vmem:[#allocation11 + $0x8] sm:$0xff]  ;;  %v1449_v15 = vld [vmem:[#allocation11 + $0x10] sm:$0xff] }
 0x3c6   : > { %1783 = vmatmul.mubr.msk.f32.vlgmr.msra.gmra.mxu1 %vm1240_vm3, %v1206_v31  ;;  %1284 = vmatpush1.msra.mxu0 %v1208_v30  ;;  %v1450_v16 = vld [vmem:[#allocation11 + $0x18] sm:$0xff] }
 0x3c7   : > { %1317 = vmatprep.mubr.f32.mxu0 %v2219_v32  ;;  %1335 = vmatprep.mubr.f32.mxu1 %v2219_v32 }
 0x3c8   : > { %1781 = vmatmul.mubr.msk.f32.vlgmr.msra.gmra.mxu0 %vm1240_vm3, %v1204_v33  ;;  %1967 = vset.pattern.permute.xlu0 %v2220_v37 }
 0x3c9   : > { %1323 = vmatprep.mubr.f32.mxu0 %v2219_v32  ;;  %1237 = vperm.xlu0 %1967, %v1219_v35  }
 0x3ca   : > { %1784 = vmatmul.mubr.msk.f32.gmra.mxu1 %vm1240_vm3, %v1207_v36  ;;  %1968 = vset.pattern.permute.xlu1 %v2220_v37 }
 0x3cb   : > { %1227 = vperm.xlu1 %1968, %v1217_v38   ;;  %1422 = vmatprep.mubr.f32.mxu1 %v2219_v32 }
 0x3cc   : > { %1782 = vmatmul.mubr.msk.f32.gmra.mxu0 %vm1240_vm3, %v1205_v39 }
 0x3cd   : > { %1232 = vperm.xlu0 %1967, %v1218_v34   ;;  %1551 = vmatprep.mubr.f32.mxu0 %v2219_v32 }
 0x3cf   : > { %1222 = vperm.xlu1 %1968, %v1216_v40  }
 0x3d1   : > { %1457 = vperm.xlu0 %1967, %v1451_v41  }
 0x3d3   : > { %1462 = vperm.xlu1 %1968, %v1452_v42  }
 0x3d5   : > { %1467 = vperm.xlu0 %1967, %v1453_v43  }
 0x3d7   : > { %1472 = vperm.xlu1 %1968, %v1454_v44  }
 0x444   : > { %v1238_v45 = vpop.permute.xlu0 %1237 }
 0x446   : > { %v1228_v50 = vpop.permute.xlu1 %1227 }
 0x448   : > { %v1233_v54 = vpop.permute.xlu0 %1232 }
 0x44a   : > { %v1223_v60 = vpop.permute.xlu1 %1222 }
 0x44c   : > { %v1458_v17 = vpop.permute.xlu0 %1457 }
 0x44e   : > { %v1463_v22 = vpop.permute.xlu1 %1462 }
 0x450   : > { %v1468_v27 = vpop.permute.xlu0 %1467 }
 0x486   : > { %v1331_v6 = vpop.f32.mrf.mxu1 }
 0x487   : > { %v1332_v58 = vadd.f32 %v1331_v6, %v1233_v54 }
 0x488   : > { %v1319_v46 = vpop.f32.mrf.mxu0  ;;  %v1333_v47 = vpop.f32.mrf.mxu1 }
 0x489   : > { %v1334_v57 = vadd.f32 %v1333_v47, %v1233_v54  ;;  %v1320_v63 = vadd.f32 %v1319_v46, %v1223_v60 }
 0x48a   : > { %v1321_v48 = vpop.f32.mrf.mxu0  ;;  %v1337_v49 = vpop.f32.mrf.mxu1 }
 0x48b   : > { %v1338_v55 = vadd.f32 %v1337_v49, %v1238_v45  ;;  %v1322_v62 = vadd.f32 %v1321_v48, %v1223_v60 }
 0x48c   : > { %v1325_v51 = vpop.f32.mrf.mxu0  ;;  %v1339_v52 = vpop.f32.mrf.mxu1 }
 0x48d   : > { %v1340_v53 = vadd.f32 %v1339_v52, %v1238_v45  ;;  %v1326_v61 = vadd.f32 %v1325_v51, %v1228_v50 }
 0x48e   : > { %v1327_v56 = vpop.f32.mrf.mxu0 }
 0x48f   : > { %1382 = vmatprep.subr.mxu1 %v1340_v53  ;;  %v1328_v59 = vadd.f32 %v1327_v56, %v1228_v50 }
 0x490   : > { %1383 = vmatpush1.msra.mxu1 %v1338_v55 }
 0x491   : > { %1384 = vmatprep.subr.mxu1 %v1334_v57 }
 0x492   : > { %1385 = vmatpush1.msra.mxu1 %v1332_v58 }
 0x493   : > { %1386 = vmatprep.subr.mxu1 %v1328_v59 }
 0x494   : > { %1387 = vmatpush1.msra.mxu1 %v1326_v61 }
 0x495   : > { %1388 = vmatprep.subr.mxu1 %v1322_v62 }
 0x496   : > { %1389 = vmatpush1.msra.mxu1 %v1320_v63 }
 0x497   : > { %1785 = vmatmul.mubr.msk.f32.vlgmr.msra.gmra.mxu1 %vm1240_vm3, %v1342_v0 }
 0x498   : > { %1428 = vmatprep.mubr.f32.mxu1 %v2219_v32 }
 0x49b   : > { %1786 = vmatmul.mubr.msk.f32.gmra.mxu1 %vm1240_vm3, %v1343_v1 }
 0x49c   : > { %1434 = vmatprep.mubr.f32.mxu1 %v2219_v32 }
 0x49f   : > { %1787 = vmatmul.mubr.msk.f32.gmra.mxu1 %vm1240_vm3, %v1344_v2 }
 0x4a0   : > { %1440 = vmatprep.mubr.f32.mxu1 %v2219_v32 }
 0x4a3   : > { %1788 = vmatmul.mubr.msk.f32.gmra.mxu1 %vm1240_vm3, %v1345_v3 }
 0x557   : > { %v1424_v4 = vpop.f32.mrf.mxu1 }
 0x559   : > { %v1426_v5 = vpop.f32.mrf.mxu1 }
 0x55b   : > { %v1430_v7 = vpop.f32.mrf.mxu1 }
 0x55d   : > { %v1432_v8 = vpop.f32.mrf.mxu1 }
 0x55f   : > { %v1436_v9 = vpop.f32.mrf.mxu1 }
 0x561   : > { %v1438_v10 = vpop.f32.mrf.mxu1 }
 0x563   : > { %v1442_v11 = vpop.f32.mrf.mxu1 }
 0x565   : > { %v1444_v12 = vpop.f32.mrf.mxu1 }
 0x566   : > { %1511 = vmatprep.subr.mxu0 %v1444_v12 }
 0x567   : > { %1512 = vmatpush1.msra.mxu0 %v1442_v11 }
 0x568   : > { %1513 = vmatprep.subr.mxu0 %v1438_v10 }
 0x569   : > { %1514 = vmatpush1.msra.mxu0 %v1436_v9 }
 0x56a   : > { %1515 = vmatprep.subr.mxu0 %v1432_v8 }
 0x56b   : > { %1516 = vmatpush1.msra.mxu0 %v1430_v7 }
 0x56c   : > { %1517 = vmatprep.subr.mxu0 %v1426_v5 }
 0x56d   : > { %1518 = vmatpush1.msra.mxu0 %v1424_v4 }
 0x56e   : > { %1789 = vmatmul.mubr.msk.f32.vlgmr.msra.gmra.mxu0 %vm1240_vm3, %v1447_v13 }
 0x56f   : > { %1557 = vmatprep.mubr.f32.mxu0 %v2219_v32 }
 0x572   : > { %1790 = vmatmul.mubr.msk.f32.gmra.mxu0 %vm1240_vm3, %v1448_v14 }
 0x573   : > { %1563 = vmatprep.mubr.f32.mxu0 %v2219_v32 }
 0x576   : > { %1791 = vmatmul.mubr.msk.f32.gmra.mxu0 %vm1240_vm3, %v1449_v15 }
 0x577   : > { %1569 = vmatprep.mubr.f32.mxu0 %v2219_v32  ;;  %v1473_v32 = vpop.permute.xlu1 %1472 }
 0x57a   : > { %1792 = vmatmul.mubr.msk.f32.gmra.mxu0 %vm1240_vm3, %v1450_v16 }
 0x62e   : > { %v1553_v18 = vpop.f32.mrf.mxu0 }
 0x62f   : > { %v1554_v19 = vadd.f32 %v1553_v18, %v1458_v17 }
 0x630   : > { %v1555_v20 = vpop.f32.mrf.mxu0 }
 0x631   : > { %1576 = vst [vmem:[%s2481_s9] sm:$0xff] %v1554_v19  ;;  %v1556_v21 = vadd.f32 %v1555_v20, %v1458_v17 }
 0x632   : > { %v1559_v23 = vpop.f32.mrf.mxu0 }
 0x633   : > { %1577 = vst [vmem:[%s2481_s9 + $0x8] sm:$0xff] %v1556_v21  ;;  %v1560_v24 = vadd.f32 %v1559_v23, %v1463_v22 }
 0x634   : > { %v1561_v25 = vpop.f32.mrf.mxu0 }
 0x635   : > { %1578 = vst [vmem:[%s2481_s9 + $0x10] sm:$0xff] %v1560_v24  ;;  %v1562_v26 = vadd.f32 %v1561_v25, %v1463_v22 }
 0x636   : > { %v1565_v28 = vpop.f32.mrf.mxu0 }
 0x637   : > { %1579 = vst [vmem:[%s2481_s9 + $0x18] sm:$0xff] %v1562_v26  ;;  %v1566_v29 = vadd.f32 %v1565_v28, %v1468_v27 }
 0x638   : > { %v1567_v30 = vpop.f32.mrf.mxu0 }
 0x639   : > { %1580 = vst [vmem:[%s2481_s9 + $0x20] sm:$0xff] %v1566_v29  ;;  %v1568_v31 = vadd.f32 %v1567_v30, %v1468_v27 }
 0x63a   : > { %v1571_v33 = vpop.f32.mrf.mxu0 }
 0x63b   : > { %1581 = vst [vmem:[%s2481_s9 + $0x28] sm:$0xff] %v1568_v31  ;;  %v1572_v35 = vadd.f32 %v1571_v33, %v1473_v32 }
 0x63c   : > { %v1573_v36 = vpop.f32.mrf.mxu0 }
 0x63d   : > { %1582 = vst [vmem:[%s2481_s9 + $0x30] sm:$0xff] %v1572_v35  ;;  %v1574_v37 = vadd.f32 %v1573_v36, %v1473_v32 }
 0x63f   : > { %1583 = vst [vmem:[%s2481_s9 + $0x38] sm:$0xff] %v1574_v37 }
 0x640 PF: > { %s1800_s21 = sshll.u32 %s2193_s25, 10  ;;  %s2795_s6 = sld [smem:[#allocation30_spill]] }
 0x641   : > { %s1602_s17 = sshll.u32 %s2481_s9, 4  ;;  %s1585_s13 = scalar_lea.sflag [#allocation7], %s2456_s18  ;;  %s2694_s17 = int_to_ptr.vmem [resolvable:$true] %s1602_s17 }
 0x642   : > { %s2101_s16 = scalar_lea.vmem %s2694_s17, 1024  ;;  %s2221_s29 = smov [#allocation14]  }
 0x643   : > { %p2102_p0 = scmp.ne.s32.totalorder %s2694_s17, %s2101_s16  ;;  %s2105_s30 = sshll.u32 %s2221_s29, 4  ;;  %s2106_s30 = int_to_ptr.vmem [resolvable:$false] %s2105_s30 }
 0x644   : > { %s2107_s25 = scalar_lea.vmem %s2106_s30, 2048  ;;  %p2108_p5 = scmp.lt.s32.totalorder %s2694_s17, %s2106_s30 }
 0x645   : > { %p2103_p2 = pnand %p2102_p0, %p2426_p12  ;;  %p2109_p11 = scmp.lt.s32.totalorder %s2107_s25, %s2101_s16 }
 0x646   : > { %s2691_s8 = scalar_lea.hbm %s2795_s6, %s1800_s21 }
 0x647   : > { %p2104_p3 = pneg %p2103_p2  ;;  %p2110_p7 = por %p2109_p11, %p2108_p5 }
 0x649   : > { %p2111_p6 = pnand %p2110_p7, %p2104_p3 }
 0x64b   : > { %2114 = shalt.err (!%p2111_p6)
}
 0x64c   : > { %s2115_s9 = scalar_lea.hbm %s2691_s8, 1024  ;;  %s2119_s20 = scalar_lea.hbm %s2795_s6, 2048 }
 0x64d   : > { %p2116_p9 = scmp.ne.s32.totalorder %s2691_s8, %s2115_s9  ;;  %p2120_p8 = scmp.lt.s32.totalorder %s2691_s8, %s2795_s6 }
 0x64e   : > { %p2121_p4 = scmp.lt.s32.totalorder %s2119_s20, %s2115_s9 }
 0x64f   : > { %p2117_p10 = pnand %p2116_p9, %p2426_p12 }
 0x650   : > { %p2122_p1 = por %p2121_p4, %p2120_p8 }
 0x651   : > { %p2118_p13 = pneg %p2117_p10 }
 0x653   : > { %p2123_p0 = pnand %p2122_p1, %p2118_p13 }
 0x655   : > { %2126 = shalt.err (!%p2123_p0)
}
 0x656   : > { %s2222_s4 = smov 256   ;;  %s2223_s16 = smov 16  }
 0x657   : > { %1827 = dma.vmem_to_hbm [thread:$0]  (%p2426_p12), %s2694_s17, 1024, %s2691_s8, %s1585_s13, %s2222_s4, %s2222_s4, %s2223_s16  }
 0x658 PF: > { %s2796_s29 = sld [smem:[#allocation19_spill]]  ;;  %p1859_p2 = scmp.ge.s32.totalorder %s2205_s28, 2 }
 0x659   : > { %s2797_s30 = sld [smem:[#allocation20_spill]] }
 0x65e   : > { %s1617_s25 = sand.u32 1, %s2796_s29  }
 0x65f   : > { %p2798_p3 = scmp.ne.s32.totalorder %s2797_s30, 0  ;;  %s1618_s9 = scalar_lea.sflag [#allocation7], %s1617_s25 }
 0x661   : > { %p1847_p5 = pnand %p1859_p2, %p2798_p3 }
 0x663   : > { %p1848_p11 = pneg %p1847_p5 }
 0x665   : > { %2172 = dma.done.wait (%p1848_p11), %s1618_s9, 1024  }
 0x666   : > { %2174 = vsyncadd (%p1848_p11), %s1618_s9, 4294966272  ;;  %s30_s28 = sadd.s32 1, %s2205_s28   ;;  %s2799_s19 = sld [smem:[#allocation21_spill]] }
 0x667   : > { %p27_p7 = scmp.ge.s32.totalorder %s30_s28, 6   ;;  %s2800_s18 = sld [smem:[#allocation22_spill]] }
 0x668   : > { %s2801_s21 = smov %s2181_s22  ;;  %s2802_s22 = smov %s2185_s23 }
 0x669   : > { %s2803_s23 = smov %s2447_s11  ;;  %s2804_s24 = smov %s2197_s26 }
 0x66a   : > { %s2805_s25 = smov %s2201_s27  ;;  %29 = sbr.rel (!%p27_p7) target bundleno = 18 (0x12), region = 148 }
 0x66c   : > { %s2806_s26 = smov %s2799_s19 }
 0x66d   : > { %s2807_s27 = smov %s2800_s18 }
 0x66f   :  { %1623 = vsyncpa [#allocation6], 1 }
 0x670   :  { %1625 = vsyncpa [#allocation6 + $0x1], 1 }
 0x671   :  { %1626 = vsyncpa [#allocation9], 1 }
 0x672   :  { %1627 = vsyncpa [#allocation12], 1 }
 0x673   :  { %1628 = vsyncpa [#allocation7], 1 }
 0x674   :  { %1630 = vsyncpa [#allocation7 + $0x1], 1 }

</bundles_post_ra>
